<compile_context>
chip_gen: v6e
topology: v6e:2x2x1
jax: 0.10.0
libtpu: 0.0.40
codegen_flags: <defaults>
</compile_context>

<pallas_src>
import functools

import jax
import jax.numpy as jnp
from jax.experimental import pallas as pl
from jax.experimental.pallas import tpu as pltpu


# ----------------------------------------------------------------------------
# Fused per-level Pallas kernel (one H-tile of one batch element per step)
# ----------------------------------------------------------------------------
def _fpn_level_kernel(*refs, has_up, emit_lat, up_scale, tile_h, compute_dtype):
    """Fused FPN level tile: 1x1 lateral conv [+ upsample-add] + 3x3 fpn conv.

    refs (in order):
      x_ref   : (1, TH, W, Cin)      input tile
      xt_ref  : (1, 1, W, Cin)       input row just above the tile (clamped)
      xb_ref  : (1, 1, W, Cin)       input row just below the tile (clamped)
      lw_ref  : (Cin, Cout)          lateral 1x1 weight
      lb_ref  : (1, Cout)            lateral bias
      fw_ref  : (3, 3, Cout, Cout)   fpn 3x3 weight
      fb_ref  : (1, Cout)            fpn bias
      up_ref  : (1, THc, Wc, Cout)   coarser merged lateral tile   (if has_up)
      ut_ref  : (1, 1, Wc, Cout)     coarse row above (clamped)    (if has_up)
      ub_ref  : (1, 1, Wc, Cout)     coarse row below (clamped)    (if has_up)
      out_ref : (1, TH, W, Cout)     fpn conv output tile
      lat_ref : (1, TH, W, Cout)     merged lateral tile           (if emit_lat)
      pad_ref : (TH+2, W+2, Cout)    VMEM scratch (padded merged lateral)
    """
    if has_up:
        (x_ref, xt_ref, xb_ref, lw_ref, lb_ref, fw_ref, fb_ref,
         up_ref, ut_ref, ub_ref, *rest) = refs
    else:
        (x_ref, xt_ref, xb_ref, lw_ref, lb_ref, fw_ref, fb_ref, *rest) = refs
        up_ref = ut_ref = ub_ref = None
    if emit_lat:
        out_ref, lat_ref, pad_ref = rest
    else:
        out_ref, pad_ref = rest
        lat_ref = None

    TH = tile_h
    _, _, W, Cin = x_ref.shape
    Cout = out_ref.shape[-1]
    s = up_scale

    h = pl.program_id(1)
    # Out-of-image halo rows contribute zero (conv zero padding).
    valid_top = (h > 0).astype(jnp.float32)
    valid_bot = (h < pl.num_programs(1) - 1).astype(jnp.float32)

    lw = lw_ref[...]
    lb = lb_ref[...]
    if compute_dtype is not None:
        lw = lw.astype(compute_dtype)

    def lateral(xval, rows):
        # 1x1 conv as (rows*W, Cin) @ (Cin, Cout) with f32 accumulation.
        xf = xval.reshape(rows * W, Cin)
        if compute_dtype is not None:
            xf = xf.astype(compute_dtype)
        y = jnp.dot(xf, lw, preferred_element_type=jnp.float32)
        return (y + lb).reshape(rows, W, Cout)

    lat_tile = lateral(x_ref[0], TH)                       # (TH, W, Cout)
    lat_top = lateral(xt_ref[0], 1)                        # (1,  W, Cout)
    lat_bot = lateral(xb_ref[0], 1)                        # (1,  W, Cout)

    # ---- fused nearest-neighbour upsample of the coarser merged lateral ---
    if has_up:
        coarse = up_ref[0].astype(jnp.float32)             # (THc, Wc, Cout)
        THc, Wc = coarse.shape[0], coarse.shape[1]
        # H direction: replicate each coarse row over s fine rows
        # (leading-dim broadcast + leading-dim collapse -> free).
        ch = jnp.broadcast_to(coarse[:, None, :, :], (THc, s, Wc, Cout))
        ch = ch.reshape(TH, Wc, Cout)
        # W direction: exact one-hot selection (MXU).
        # TODO(synk): move off the MXU (XLU/strided replication) once that
        #             lowering is validated; H-tiling already bounds the temp.
        wi = jax.lax.broadcasted_iota(jnp.int32, (W, Wc), 0) // s
        ki = jax.lax.broadcasted_iota(jnp.int32, (W, Wc), 1)
        sel = (wi == ki).astype(jnp.float32)               # (W, Wc)
        sel_b = jnp.broadcast_to(sel[None], (TH, W, Wc))
        up_tile = jax.lax.dot_general(
            sel_b, ch,
            dimension_numbers=(((2,), (1,)), ((0,), (0,))),
            preferred_element_type=jnp.float32)            # (TH, W, Cout)
        lat_tile = lat_tile + up_tile
        up_top = jnp.dot(sel, ut_ref[0, 0].astype(jnp.float32),
                         preferred_element_type=jnp.float32)
        up_bot = jnp.dot(sel, ub_ref[0, 0].astype(jnp.float32),
                         preferred_element_type=jnp.float32)
        lat_top = lat_top + up_top.reshape(1, W, Cout)
        lat_bot = lat_bot + up_bot.reshape(1, W, Cout)

    lat_top = lat_top * valid_top
    lat_bot = lat_bot * valid_bot

    if emit_lat:
        lat_ref[...] = lat_tile.reshape(1, TH, W, Cout).astype(lat_ref.dtype)

    # ---- 3x3 fpn conv (padding=1) from a VMEM scratch with H-halo rows -----
    # Only the two 1-wide W-border columns are zeroed; all other scratch
    # elements are overwritten every step (no full memset, no cross-step
    # state -> safe under megacore grid partitioning).
    zcol = jnp.zeros((TH + 2, 1, Cout), jnp.float32)
    pad_ref[:, 0:1, :] = zcol
    pad_ref[:, W + 1:W + 2, :] = zcol
    pad_ref[0:1, 1:W + 1, :] = lat_top
    pad_ref[TH + 1:TH + 2, 1:W + 1, :] = lat_bot
    pad_ref[1:TH + 1, 1:W + 1, :] = lat_tile

    fb = fb_ref[...]
    acc = jnp.zeros((TH * W, Cout), jnp.float32)
    for kh in range(3):                                    # static unroll, 9 taps
        for kw in range(3):
            patch = pad_ref[kh:kh + TH, kw:kw + W, :].reshape(TH * W, Cout)
            w_tap = fw_ref[kh, kw]
            if compute_dtype is not None:
                patch = patch.astype(compute_dtype)
                w_tap = w_tap.astype(compute_dtype)
            acc = acc + jnp.dot(patch, w_tap, preferred_element_type=jnp.float32)
    acc = acc + fb
    out_ref[...] = acc.reshape(1, TH, W, Cout).astype(out_ref.dtype)


def _pick_tile_h(H, s, max_tile_h):
    """Largest tile height <= max_tile_h that divides H and is a multiple of s."""
    best = H
    for th in range(s, min(H, max_tile_h) + 1, s):
        if H % th == 0:
            best = th
    assert H % best == 0 and best % s == 0, (H, s, best)
    return best


def fpn_level(x, lw, lb, fw, fb, *, up=None, up_scale=1, emit_lat=False,
              max_tile_h=32, compute_dtype=None):
    """One fully fused, H-tiled FPN level on NHWC tensors.

    Returns `out`, or `(out, merged_lateral)` when emit_lat is True.
    """
    N, H, W, Cin = x.shape
    Cout = lw.shape[1]
    has_up = up is not None
    s = up_scale if has_up else 1

    Hc = Wc = 0
    if has_up:
        _, Hc, Wc, Cu = up.shape
        assert Cu == Cout and Hc * s == H and Wc * s == W, (up.shape, x.shape, s)

    TH = _pick_tile_h(H, s, max_tile_h)
    nH = H // TH
    THc = TH // s

    in_specs = [
        # input tile + clamped 1-row halos (halo laterals are recomputed
        # in-kernel so both grid axes stay fully parallel).
        pl.BlockSpec((1, TH, W, Cin), lambda n, h: (n, h, 0, 0)),
        pl.BlockSpec((1, 1, W, Cin),
                     lambda n, h: (n, jnp.maximum(h * TH - 1, 0), 0, 0)),
        pl.BlockSpec((1, 1, W, Cin),
                     lambda n, h: (n, jnp.minimum(h * TH + TH, H - 1), 0, 0)),
        # weights / biases (constant across the grid).
        # TODO(synk): pipeline_mode=pl.Buffered(1) to drop their double buffer.
        pl.BlockSpec((Cin, Cout), lambda n, h: (0, 0)),
        pl.BlockSpec((1, Cout), lambda n, h: (0, 0)),
        pl.BlockSpec((3, 3, Cout, Cout), lambda n, h: (0, 0, 0, 0)),
        pl.BlockSpec((1, Cout), lambda n, h: (0, 0)),
    ]
    args = [x, x, x, lw, lb.reshape(1, Cout), fw, fb.reshape(1, Cout)]
    if has_up:
        in_specs += [
            pl.BlockSpec((1, THc, Wc, Cout), lambda n, h: (n, h, 0, 0)),
            pl.BlockSpec((1, 1, Wc, Cout),
                         lambda n, h: (n, jnp.maximum(h * THc - 1, 0), 0, 0)),
            pl.BlockSpec((1, 1, Wc, Cout),
                         lambda n, h: (n, jnp.minimum(h * THc + THc, Hc - 1), 0, 0)),
        ]
        args += [up, up, up]

    out_spec = pl.BlockSpec((1, TH, W, Cout), lambda n, h: (n, h, 0, 0))
    if emit_lat:
        out_shape = (jax.ShapeDtypeStruct((N, H, W, Cout), x.dtype),
                     jax.ShapeDtypeStruct((N, H, W, Cout), x.dtype))
        out_specs = (out_spec, out_spec)
    else:
        out_shape = jax.ShapeDtypeStruct((N, H, W, Cout), x.dtype)
        out_specs = out_spec

    # VMEM budget (double-buffered pipeline blocks + weights + scratch), with
    # generous headroom; advisory cost estimate for the XLA scheduler.
    fb4 = 4
    est = 2 * (TH + 2) * W * Cin * fb4
    est += 2 * (2 if emit_lat else 1) * TH * W * Cout * fb4
    if has_up:
        est += 2 * (THc + 2) * Wc * Cout * fb4
    est += 2 * (Cin * Cout + 9 * Cout * Cout + 2 * Cout) * fb4
    est += (TH + 2) * (W + 2) * Cout * fb4
    vmem_limit = int(min(100 * 2 ** 20, 3 * est + (16 << 20)))

    flops = 2 * N * H * W * Cout * (Cin + 9 * Cout)
    bytes_accessed = (x.size * x.dtype.itemsize
                      + (2 if emit_lat else 1) * N * H * W * Cout * fb4
                      + (up.size * up.dtype.itemsize if has_up else 0)
                      + (lw.size + fw.size + 2 * Cout) * fb4)
    cost = pl.CostEstimate(flops=int(flops), transcendentals=0,
                           bytes_accessed=int(bytes_accessed))

    kernel = functools.partial(
        _fpn_level_kernel, has_up=has_up, emit_lat=emit_lat,
        up_scale=s, tile_h=TH, compute_dtype=compute_dtype)

    return pl.pallas_call(
        kernel,
        out_shape=out_shape,
        grid_spec=pltpu.PrefetchScalarGridSpec(
            num_scalar_prefetch=0,
            grid=(N, nH),
            in_specs=in_specs,
            out_specs=out_specs,
            scratch_shapes=[pltpu.VMEM((TH + 2, W + 2, Cout), jnp.float32)],
        ),
        compiler_params=pltpu.CompilerParams(
            dimension_semantics=("parallel", "parallel"),
            vmem_limit_bytes=vmem_limit),
        cost_estimate=cost,
    )(*args)


# ----------------------------------------------------------------------------
# FPN module (parameters + forward)
# ----------------------------------------------------------------------------
class FPNPallas:
    """Pallas TPU port of det3d FPN (add_extra_convs=False, norm/act=None)."""

    def __init__(self, in_channels, out_channels, num_outs, strides,
                 start_level=0, end_level=-1, key=None,
                 max_tile_h=32, compute_dtype=None):
        assert isinstance(in_channels, list)
        self.in_channels = in_channels
        self.out_channels = out_channels
        self.num_ins = len(in_channels)
        self.num_outs = num_outs
        self.strides = strides
        self.max_tile_h = max_tile_h
        self.compute_dtype = compute_dtype
        if end_level == -1:
            self.backbone_end_level = self.num_ins
            assert num_outs >= self.num_ins - start_level
        else:
            self.backbone_end_level = end_level
            assert end_level <= len(in_channels)
            assert num_outs == end_level - start_level
        self.start_level = start_level

        if key is None:
            key = jax.random.PRNGKey(0)

        # Deterministic xavier-uniform-style init.  PyTorch conv weight
        # (Cout,Cin,KH,KW) is stored as (Cin,Cout) for 1x1 and (KH,KW,Cin,Cout)
        # for 3x3 (NHWC kernels).
        self.lateral_w, self.lateral_b = [], []
        self.fpn_w, self.fpn_b = [], []
        for i in range(self.start_level, self.backbone_end_level):
            key, k1, k2, k3, k4 = jax.random.split(key, 5)
            cin = in_channels[i]
            lim1 = (6.0 / (cin + out_channels)) ** 0.5
            self.lateral_w.append(jax.random.uniform(
                k1, (cin, out_channels), jnp.float32, -lim1, lim1))
            self.lateral_b.append(jax.random.uniform(
                k2, (out_channels,), jnp.float32, -0.1, 0.1))
            lim3 = (6.0 / (9 * out_channels + 9 * out_channels)) ** 0.5
            self.fpn_w.append(jax.random.uniform(
                k3, (3, 3, out_channels, out_channels), jnp.float32,
                -lim3, lim3))
            self.fpn_b.append(jax.random.uniform(
                k4, (out_channels,), jnp.float32, -0.1, 0.1))

    def __call__(self, inputs):
        # inputs: list of NCHW arrays (PyTorch convention).
        assert len(inputs) == len(self.in_channels)
        # TODO(synk): fuse this transpose into the level kernel (trans-LHS dot).
        xs = [jnp.transpose(x, (0, 2, 3, 1)) for x in inputs]  # -> NHWC

        used = self.backbone_end_level - self.start_level
        outs = [None] * used
        lat_above = None          # merged lateral of the level above (NHWC)
        for i in range(used - 1, -1, -1):                 # top-down, fused
            has_up = i < used - 1
            emit_lat = i > 0
            res = fpn_level(
                xs[i + self.start_level],
                self.lateral_w[i], self.lateral_b[i],
                self.fpn_w[i], self.fpn_b[i],
                up=lat_above if has_up else None,
                up_scale=self.strides[i + 1] if has_up else 1,
                emit_lat=emit_lat,
                max_tile_h=self.max_tile_h,
                compute_dtype=self.compute_dtype)
            if emit_lat:
                outs[i], lat_above = res
            else:
                outs[i] = res

        # Extra outputs (add_extra_convs=False): max_pool2d(kernel=1, stride=2)
        # == exact stride-2 subsample -> pure indexing glue.
        for _ in range(self.num_outs - used):
            outs.append(outs[-1][:, ::2, ::2, :])

        # Back to NCHW to match PyTorch output convention.
        return tuple(jnp.transpose(o, (0, 3, 1, 2)) for o in outs)


# ----------------------------------------------------------------------------
# Pure-JAX reference (for correctness check)
# ----------------------------------------------------------------------------
def ref_fpn(inputs, model):
    def conv(x_nchw, w_hwio, b, pad):
        y = jax.lax.conv_general_dilated(
            x_nchw, w_hwio, (1, 1), [(pad, pad), (pad, pad)],
            dimension_numbers=("NCHW", "HWIO", "NCHW"),
            precision=jax.lax.Precision.HIGHEST)
        return y + b.reshape(1, -1, 1, 1)

    laterals = []
    for i in range(len(model.lateral_w)):
        w = model.lateral_w[i]
        laterals.append(conv(inputs[i + model.start_level],
                             w.reshape(1, 1, *w.shape), model.lateral_b[i], 0))
    for i in range(len(laterals) - 1, 0, -1):
        s = model.strides[i]
        up = jnp.repeat(jnp.repeat(laterals[i], s, axis=2), s, axis=3)
        laterals[i - 1] = laterals[i - 1] + up
    outs = [conv(laterals[i], model.fpn_w[i], model.fpn_b[i], 1)
            for i in range(len(laterals))]
    for _ in range(model.num_outs - len(laterals)):
        outs.append(outs[-1][:, :, ::2, ::2])
    return tuple(outs)


# ----------------------------------------------------------------------------
if __name__ == "__main__":
    key = jax.random.PRNGKey(0)
    kx0, kx1, kx2, kp = jax.random.split(key, 4)

    in_channels = [4, 8, 8]
    out_channels = 8
    num_outs = 4
    strides = [1, 2, 2]   # inter-level F.interpolate scale factors, per spec

    # NCHW inputs, consistent with the PyTorch module.
    x0 = jax.random.normal(kx0, (2, 4, 32, 32), jnp.float32)
    x1 = jax.random.normal(kx1, (2, 8, 16, 16), jnp.float32)
    x2 = jax.random.normal(kx2, (2, 8, 8, 8), jnp.float32)

    # max_tile_h=8 so the 32- and 16-row levels actually exercise the H-tiled
    # halo path (grid=(2,4) / (2,2)) and are validated against the reference.
    model = FPNPallas(in_channels, out_channels, num_outs, strides,
                      key=kp, max_tile_h=8)

    outs = model([x0, x1, x2])
    outs = jax.block_until_ready(outs)

    refs = ref_fpn([x0, x1, x2], model)
    assert len(outs) == num_outs
    for o, r in zip(outs, refs):
        assert o.shape == r.shape, (o.shape, r.shape)
        err = float(jnp.max(jnp.abs(o - r)))
        assert err < 2e-3, f"max abs err {err}"

    print("KERNEL_OK")
</pallas_src>

<mosaic_0001>
module attributes {stable_mosaic.version = 11 : i64} {
  func.func @_fpn_level_kernel(%arg0: i32, %arg1: i32, %arg2: memref<1x8x8x8xf32, #tpu.memory_space<vmem>>, %arg3: memref<1x1x8x8xf32, #tpu.memory_space<vmem>>, %arg4: memref<1x1x8x8xf32, #tpu.memory_space<vmem>>, %arg5: memref<8x8xf32, #tpu.memory_space<vmem>>, %arg6: memref<1x8xf32, #tpu.memory_space<vmem>>, %arg7: memref<3x3x8x8xf32, #tpu.memory_space<vmem>>, %arg8: memref<1x8xf32, #tpu.memory_space<vmem>>, %arg9: memref<1x8x8x8xf32, #tpu.memory_space<vmem>>, %arg10: memref<1x8x8x8xf32, #tpu.memory_space<vmem>>, %arg11: memref<10x10x8xf32, #tpu.memory_space<vmem>>) attributes {dimension_semantics = [#tpu.dimension_semantics<parallel>, #tpu.dimension_semantics<parallel>], iteration_bounds = array<i64: 2, 1>, scalar_prefetch = 0 : i64, scratch_operands = 1 : i64, tpu.core_type = #tpu.core_type<tc>, window_params = [{transform_indices = @transform_0, window_bounds = array<i64: 1, 8, 8, 8>}, {transform_indices = @transform_1, window_bounds = array<i64: 1, 1, 8, 8>}, {transform_indices = @transform_2, window_bounds = array<i64: 1, 1, 8, 8>}, {pipeline_mode = #tpu.pipeline_mode<synchronous>, transform_indices = @transform_3, window_bounds = array<i64: 8, 8>}, {pipeline_mode = #tpu.pipeline_mode<synchronous>, transform_indices = @transform_4, window_bounds = array<i64: 1, 8>}, {pipeline_mode = #tpu.pipeline_mode<synchronous>, transform_indices = @transform_5, window_bounds = array<i64: 3, 3, 8, 8>}, {pipeline_mode = #tpu.pipeline_mode<synchronous>, transform_indices = @transform_6, window_bounds = array<i64: 1, 8>}, {transform_indices = @transform_7, window_bounds = array<i64: 1, 8, 8, 8>}, {transform_indices = @transform_8, window_bounds = array<i64: 1, 8, 8, 8>}]} {
    %c0_i32 = arith.constant 0 : i32
    %0 = arith.cmpi sgt, %arg1, %c0_i32 : i32
    %1 = arith.extui %0 : i1 to i32
    %2 = arith.sitofp %1 : i32 to f32
    %c0_i32_0 = arith.constant 0 : i32
    %3 = arith.cmpi slt, %arg1, %c0_i32_0 : i32
    %4 = arith.extui %3 : i1 to i32
    %5 = arith.sitofp %4 : i32 to f32
    %c0 = arith.constant 0 : index
    %c0_1 = arith.constant 0 : index
    %6 = vector.load %arg5[%c0, %c0_1] : memref<8x8xf32, #tpu.memory_space<vmem>>, vector<8x8xf32>
    %c0_2 = arith.constant 0 : index
    %c0_3 = arith.constant 0 : index
    %7 = vector.load %arg6[%c0_2, %c0_3] : memref<1x8xf32, #tpu.memory_space<vmem>>, vector<1x8xf32>
    %c0_4 = arith.constant 0 : index
    %c0_5 = arith.constant 0 : index
    %c0_6 = arith.constant 0 : index
    %c0_7 = arith.constant 0 : index
    %8 = vector.load %arg2[%c0_4, %c0_5, %c0_6, %c0_7] : memref<1x8x8x8xf32, #tpu.memory_space<vmem>>, vector<1x8x8x8xf32>
    %9 = vector.shape_cast %8 : vector<1x8x8x8xf32> to vector<8x8x8xf32>
    %10 = vector.shape_cast %9 : vector<8x8x8xf32> to vector<64x8xf32>
    %cst = arith.constant dense<0.000000e+00> : vector<64x8xf32>
    %11 = tpu.matmul %10, %6, %cst {dimension_numbers = #tpu.dot_dimension_numbers<[1], [0], [0], [1], [0, 0, 1, 1], [], []>} : vector<64x8xf32>, vector<8x8xf32>, vector<64x8xf32> -> vector<64x8xf32>
    %12 = vector.broadcast %7 : vector<1x8xf32> to vector<64x8xf32>
    %13 = arith.addf %11, %12 : vector<64x8xf32>
    %14 = vector.shape_cast %13 : vector<64x8xf32> to vector<8x8x8xf32>
    %c0_8 = arith.constant 0 : index
    %c0_9 = arith.constant 0 : index
    %c0_10 = arith.constant 0 : index
    %c0_11 = arith.constant 0 : index
    %15 = vector.load %arg3[%c0_8, %c0_9, %c0_10, %c0_11] : memref<1x1x8x8xf32, #tpu.memory_space<vmem>>, vector<1x1x8x8xf32>
    %16 = vector.shape_cast %15 : vector<1x1x8x8xf32> to vector<1x8x8xf32>
    %17 = vector.shape_cast %16 : vector<1x8x8xf32> to vector<8x8xf32>
    %cst_12 = arith.constant dense<0.000000e+00> : vector<8x8xf32>
    %18 = tpu.matmul %17, %6, %cst_12 {dimension_numbers = #tpu.dot_dimension_numbers<[1], [0], [0], [1], [0, 0, 1, 1], [], []>} : vector<8x8xf32>, vector<8x8xf32>, vector<8x8xf32> -> vector<8x8xf32>
    %19 = vector.broadcast %7 : vector<1x8xf32> to vector<8x8xf32>
    %20 = arith.addf %18, %19 : vector<8x8xf32>
    %21 = vector.shape_cast %20 : vector<8x8xf32> to vector<1x8x8xf32>
    %c0_13 = arith.constant 0 : index
    %c0_14 = arith.constant 0 : index
    %c0_15 = arith.constant 0 : index
    %c0_16 = arith.constant 0 : index
    %22 = vector.load %arg4[%c0_13, %c0_14, %c0_15, %c0_16] : memref<1x1x8x8xf32, #tpu.memory_space<vmem>>, vector<1x1x8x8xf32>
    %23 = vector.shape_cast %22 : vector<1x1x8x8xf32> to vector<1x8x8xf32>
    %24 = vector.shape_cast %23 : vector<1x8x8xf32> to vector<8x8xf32>
    %cst_17 = arith.constant dense<0.000000e+00> : vector<8x8xf32>
    %25 = tpu.matmul %24, %6, %cst_17 {dimension_numbers = #tpu.dot_dimension_numbers<[1], [0], [0], [1], [0, 0, 1, 1], [], []>} : vector<8x8xf32>, vector<8x8xf32>, vector<8x8xf32> -> vector<8x8xf32>
    %26 = vector.broadcast %7 : vector<1x8xf32> to vector<8x8xf32>
    %27 = arith.addf %25, %26 : vector<8x8xf32>
    %28 = vector.shape_cast %27 : vector<8x8xf32> to vector<1x8x8xf32>
    %29 = vector.broadcast %2 : f32 to vector<1x8x8xf32>
    %30 = arith.mulf %21, %29 : vector<1x8x8xf32>
    %31 = vector.broadcast %5 : f32 to vector<1x8x8xf32>
    %32 = arith.mulf %28, %31 : vector<1x8x8xf32>
    %33 = vector.shape_cast %14 : vector<8x8x8xf32> to vector<1x8x8x8xf32>
    %c0_18 = arith.constant 0 : index
    %c0_19 = arith.constant 0 : index
    %c0_20 = arith.constant 0 : index
    %c0_21 = arith.constant 0 : index
    %34 = vector.load %arg10[%c0_18, %c0_19, %c0_20, %c0_21] : memref<1x8x8x8xf32, #tpu.memory_space<vmem>>, vector<1x8x8x8xf32>
    tpu.vector_store %arg10[%c0_18, %c0_19, %c0_20, %c0_21], %33 {strides = array<i32>} : memref<1x8x8x8xf32, #tpu.memory_space<vmem>>, vector<1x8x8x8xf32>,
    %cst_22 = arith.constant 0.000000e+00 : f32
    %35 = vector.broadcast %cst_22 : f32 to vector<10x1x8xf32>
    %c0_23 = arith.constant 0 : index
    %c0_24 = arith.constant 0 : index
    %c0_25 = arith.constant 0 : index
    %36 = vector.load %arg11[%c0_23, %c0_24, %c0_25] : memref<10x10x8xf32, #tpu.memory_space<vmem>>, vector<10x1x8xf32>
    tpu.vector_store %arg11[%c0_23, %c0_24, %c0_25], %35 {strides = array<i32>} : memref<10x10x8xf32, #tpu.memory_space<vmem>>, vector<10x1x8xf32>,
    %c0_26 = arith.constant 0 : index
    %c9 = arith.constant 9 : index
    %c0_27 = arith.constant 0 : index
    %37 = vector.load %arg11[%c0_26, %c9, %c0_27] : memref<10x10x8xf32, #tpu.memory_space<vmem>>, vector<10x1x8xf32>
    tpu.vector_store %arg11[%c0_26, %c9, %c0_27], %35 {strides = array<i32>} : memref<10x10x8xf32, #tpu.memory_space<vmem>>, vector<10x1x8xf32>,
    %c0_28 = arith.constant 0 : index
    %c1 = arith.constant 1 : index
    %c0_29 = arith.constant 0 : index
    %38 = vector.load %arg11[%c0_28, %c1, %c0_29] : memref<10x10x8xf32, #tpu.memory_space<vmem>>, vector<1x8x8xf32>
    tpu.vector_store %arg11[%c0_28, %c1, %c0_29], %30 {strides = array<i32>} : memref<10x10x8xf32, #tpu.memory_space<vmem>>, vector<1x8x8xf32>,
    %c9_30 = arith.constant 9 : index
    %c1_31 = arith.constant 1 : index
    %c0_32 = arith.constant 0 : index
    %39 = vector.load %arg11[%c9_30, %c1_31, %c0_32] : memref<10x10x8xf32, #tpu.memory_space<vmem>>, vector<1x8x8xf32>
    tpu.vector_store %arg11[%c9_30, %c1_31, %c0_32], %32 {strides = array<i32>} : memref<10x10x8xf32, #tpu.memory_space<vmem>>, vector<1x8x8xf32>,
    %c1_33 = arith.constant 1 : index
    %c1_34 = arith.constant 1 : index
    %c0_35 = arith.constant 0 : index
    %40 = vector.load %arg11[%c1_33, %c1_34, %c0_35] : memref<10x10x8xf32, #tpu.memory_space<vmem>>, vector<8x8x8xf32>
    tpu.vector_store %arg11[%c1_33, %c1_34, %c0_35], %14 {strides = array<i32>} : memref<10x10x8xf32, #tpu.memory_space<vmem>>, vector<8x8x8xf32>,
    %c0_36 = arith.constant 0 : index
    %c0_37 = arith.constant 0 : index
    %41 = vector.load %arg8[%c0_36, %c0_37] : memref<1x8xf32, #tpu.memory_space<vmem>>, vector<1x8xf32>
    %cst_38 = arith.constant 0.000000e+00 : f32
    %42 = vector.broadcast %cst_38 : f32 to vector<64x8xf32>
    %c0_39 = arith.constant 0 : index
    %c0_40 = arith.constant 0 : index
    %c0_41 = arith.constant 0 : index
    %43 = vector.load %arg11[%c0_39, %c0_40, %c0_41] : memref<10x10x8xf32, #tpu.memory_space<vmem>>, vector<8x8x8xf32>
    %44 = vector.shape_cast %43 : vector<8x8x8xf32> to vector<64x8xf32>
    %c0_42 = arith.constant 0 : index
    %c0_43 = arith.constant 0 : index
    %c0_44 = arith.constant 0 : index
    %c0_45 = arith.constant 0 : index
    %45 = vector.load %arg7[%c0_42, %c0_43, %c0_44, %c0_45] : memref<3x3x8x8xf32, #tpu.memory_space<vmem>>, vector<1x1x8x8xf32>
    %46 = vector.shape_cast %45 : vector<1x1x8x8xf32> to vector<8x8xf32>
    %cst_46 = arith.constant dense<0.000000e+00> : vector<64x8xf32>
    %47 = tpu.matmul %44, %46, %cst_46 {dimension_numbers = #tpu.dot_dimension_numbers<[1], [0], [0], [1], [0, 0, 1, 1], [], []>} : vector<64x8xf32>, vector<8x8xf32>, vector<64x8xf32> -> vector<64x8xf32>
    %48 = arith.addf %42, %47 : vector<64x8xf32>
    %c0_47 = arith.constant 0 : index
    %c1_48 = arith.constant 1 : index
    %c0_49 = arith.constant 0 : index
    %49 = vector.load %arg11[%c0_47, %c1_48, %c0_49] : memref<10x10x8xf32, #tpu.memory_space<vmem>>, vector<8x8x8xf32>
    %50 = vector.shape_cast %49 : vector<8x8x8xf32> to vector<64x8xf32>
    %c0_50 = arith.constant 0 : index
    %c1_51 = arith.constant 1 : index
    %c0_52 = arith.constant 0 : index
    %c0_53 = arith.constant 0 : index
    %51 = vector.load %arg7[%c0_50, %c1_51, %c0_52, %c0_53] : memref<3x3x8x8xf32, #tpu.memory_space<vmem>>, vector<1x1x8x8xf32>
    %52 = vector.shape_cast %51 : vector<1x1x8x8xf32> to vector<8x8xf32>
    %cst_54 = arith.constant dense<0.000000e+00> : vector<64x8xf32>
    %53 = tpu.matmul %50, %52, %cst_54 {dimension_numbers = #tpu.dot_dimension_numbers<[1], [0], [0], [1], [0, 0, 1, 1], [], []>} : vector<64x8xf32>, vector<8x8xf32>, vector<64x8xf32> -> vector<64x8xf32>
    %54 = arith.addf %48, %53 : vector<64x8xf32>
    %c0_55 = arith.constant 0 : index
    %c2 = arith.constant 2 : index
    %c0_56 = arith.constant 0 : index
    %55 = vector.load %arg11[%c0_55, %c2, %c0_56] : memref<10x10x8xf32, #tpu.memory_space<vmem>>, vector<8x8x8xf32>
    %56 = vector.shape_cast %55 : vector<8x8x8xf32> to vector<64x8xf32>
    %c0_57 = arith.constant 0 : index
    %c2_58 = arith.constant 2 : index
    %c0_59 = arith.constant 0 : index
    %c0_60 = arith.constant 0 : index
    %57 = vector.load %arg7[%c0_57, %c2_58, %c0_59, %c0_60] : memref<3x3x8x8xf32, #tpu.memory_space<vmem>>, vector<1x1x8x8xf32>
    %58 = vector.shape_cast %57 : vector<1x1x8x8xf32> to vector<8x8xf32>
    %cst_61 = arith.constant dense<0.000000e+00> : vector<64x8xf32>
    %59 = tpu.matmul %56, %58, %cst_61 {dimension_numbers = #tpu.dot_dimension_numbers<[1], [0], [0], [1], [0, 0, 1, 1], [], []>} : vector<64x8xf32>, vector<8x8xf32>, vector<64x8xf32> -> vector<64x8xf32>
    %60 = arith.addf %54, %59 : vector<64x8xf32>
    %c1_62 = arith.constant 1 : index
    %c0_63 = arith.constant 0 : index
    %c0_64 = arith.constant 0 : index
    %61 = vector.load %arg11[%c1_62, %c0_63, %c0_64] : memref<10x10x8xf32, #tpu.memory_space<vmem>>, vector<8x8x8xf32>
    %62 = vector.shape_cast %61 : vector<8x8x8xf32> to vector<64x8xf32>
    %c1_65 = arith.constant 1 : index
    %c0_66 = arith.constant 0 : index
    %c0_67 = arith.constant 0 : index
    %c0_68 = arith.constant 0 : index
    %63 = vector.load %arg7[%c1_65, %c0_66, %c0_67, %c0_68] : memref<3x3x8x8xf32, #tpu.memory_space<vmem>>, vector<1x1x8x8xf32>
    %64 = vector.shape_cast %63 : vector<1x1x8x8xf32> to vector<8x8xf32>
    %cst_69 = arith.constant dense<0.000000e+00> : vector<64x8xf32>
    %65 = tpu.matmul %62, %64, %cst_69 {dimension_numbers = #tpu.dot_dimension_numbers<[1], [0], [0], [1], [0, 0, 1, 1], [], []>} : vector<64x8xf32>, vector<8x8xf32>, vector<64x8xf32> -> vector<64x8xf32>
    %66 = arith.addf %60, %65 : vector<64x8xf32>
    %c1_70 = arith.constant 1 : index
    %c1_71 = arith.constant 1 : index
    %c0_72 = arith.constant 0 : index
    %67 = vector.load %arg11[%c1_70, %c1_71, %c0_72] : memref<10x10x8xf32, #tpu.memory_space<vmem>>, vector<8x8x8xf32>
    %68 = vector.shape_cast %67 : vector<8x8x8xf32> to vector<64x8xf32>
    %c1_73 = arith.constant 1 : index
    %c1_74 = arith.constant 1 : index
    %c0_75 = arith.constant 0 : index
    %c0_76 = arith.constant 0 : index
    %69 = vector.load %arg7[%c1_73, %c1_74, %c0_75, %c0_76] : memref<3x3x8x8xf32, #tpu.memory_space<vmem>>, vector<1x1x8x8xf32>
    %70 = vector.shape_cast %69 : vector<1x1x8x8xf32> to vector<8x8xf32>
    %cst_77 = arith.constant dense<0.000000e+00> : vector<64x8xf32>
    %71 = tpu.matmul %68, %70, %cst_77 {dimension_numbers = #tpu.dot_dimension_numbers<[1], [0], [0], [1], [0, 0, 1, 1], [], []>} : vector<64x8xf32>, vector<8x8xf32>, vector<64x8xf32> -> vector<64x8xf32>
    %72 = arith.addf %66, %71 : vector<64x8xf32>
    %c1_78 = arith.constant 1 : index
    %c2_79 = arith.constant 2 : index
    %c0_80 = arith.constant 0 : index
    %73 = vector.load %arg11[%c1_78, %c2_79, %c0_80] : memref<10x10x8xf32, #tpu.memory_space<vmem>>, vector<8x8x8xf32>
    %74 = vector.shape_cast %73 : vector<8x8x8xf32> to vector<64x8xf32>
    %c1_81 = arith.constant 1 : index
    %c2_82 = arith.constant 2 : index
    %c0_83 = arith.constant 0 : index
    %c0_84 = arith.constant 0 : index
    %75 = vector.load %arg7[%c1_81, %c2_82, %c0_83, %c0_84] : memref<3x3x8x8xf32, #tpu.memory_space<vmem>>, vector<1x1x8x8xf32>
    %76 = vector.shape_cast %75 : vector<1x1x8x8xf32> to vector<8x8xf32>
    %cst_85 = arith.constant dense<0.000000e+00> : vector<64x8xf32>
    %77 = tpu.matmul %74, %76, %cst_85 {dimension_numbers = #tpu.dot_dimension_numbers<[1], [0], [0], [1], [0, 0, 1, 1], [], []>} : vector<64x8xf32>, vector<8x8xf32>, vector<64x8xf32> -> vector<64x8xf32>
    %78 = arith.addf %72, %77 : vector<64x8xf32>
    %c2_86 = arith.constant 2 : index
    %c0_87 = arith.constant 0 : index
    %c0_88 = arith.constant 0 : index
    %79 = vector.load %arg11[%c2_86, %c0_87, %c0_88] : memref<10x10x8xf32, #tpu.memory_space<vmem>>, vector<8x8x8xf32>
    %80 = vector.shape_cast %79 : vector<8x8x8xf32> to vector<64x8xf32>
    %c2_89 = arith.constant 2 : index
    %c0_90 = arith.constant 0 : index
    %c0_91 = arith.constant 0 : index
    %c0_92 = arith.constant 0 : index
    %81 = vector.load %arg7[%c2_89, %c0_90, %c0_91, %c0_92] : memref<3x3x8x8xf32, #tpu.memory_space<vmem>>, vector<1x1x8x8xf32>
    %82 = vector.shape_cast %81 : vector<1x1x8x8xf32> to vector<8x8xf32>
    %cst_93 = arith.constant dense<0.000000e+00> : vector<64x8xf32>
    %83 = tpu.matmul %80, %82, %cst_93 {dimension_numbers = #tpu.dot_dimension_numbers<[1], [0], [0], [1], [0, 0, 1, 1], [], []>} : vector<64x8xf32>, vector<8x8xf32>, vector<64x8xf32> -> vector<64x8xf32>
    %84 = arith.addf %78, %83 : vector<64x8xf32>
    %c2_94 = arith.constant 2 : index
    %c1_95 = arith.constant 1 : index
    %c0_96 = arith.constant 0 : index
    %85 = vector.load %arg11[%c2_94, %c1_95, %c0_96] : memref<10x10x8xf32, #tpu.memory_space<vmem>>, vector<8x8x8xf32>
    %86 = vector.shape_cast %85 : vector<8x8x8xf32> to vector<64x8xf32>
    %c2_97 = arith.constant 2 : index
    %c1_98 = arith.constant 1 : index
    %c0_99 = arith.constant 0 : index
    %c0_100 = arith.constant 0 : index
    %87 = vector.load %arg7[%c2_97, %c1_98, %c0_99, %c0_100] : memref<3x3x8x8xf32, #tpu.memory_space<vmem>>, vector<1x1x8x8xf32>
    %88 = vector.shape_cast %87 : vector<1x1x8x8xf32> to vector<8x8xf32>
    %cst_101 = arith.constant dense<0.000000e+00> : vector<64x8xf32>
    %89 = tpu.matmul %86, %88, %cst_101 {dimension_numbers = #tpu.dot_dimension_numbers<[1], [0], [0], [1], [0, 0, 1, 1], [], []>} : vector<64x8xf32>, vector<8x8xf32>, vector<64x8xf32> -> vector<64x8xf32>
    %90 = arith.addf %84, %89 : vector<64x8xf32>
    %c2_102 = arith.constant 2 : index
    %c2_103 = arith.constant 2 : index
    %c0_104 = arith.constant 0 : index
    %91 = vector.load %arg11[%c2_102, %c2_103, %c0_104] : memref<10x10x8xf32, #tpu.memory_space<vmem>>, vector<8x8x8xf32>
    %92 = vector.shape_cast %91 : vector<8x8x8xf32> to vector<64x8xf32>
    %c2_105 = arith.constant 2 : index
    %c2_106 = arith.constant 2 : index
    %c0_107 = arith.constant 0 : index
    %c0_108 = arith.constant 0 : index
    %93 = vector.load %arg7[%c2_105, %c2_106, %c0_107, %c0_108] : memref<3x3x8x8xf32, #tpu.memory_space<vmem>>, vector<1x1x8x8xf32>
    %94 = vector.shape_cast %93 : vector<1x1x8x8xf32> to vector<8x8xf32>
    %cst_109 = arith.constant dense<0.000000e+00> : vector<64x8xf32>
    %95 = tpu.matmul %92, %94, %cst_109 {dimension_numbers = #tpu.dot_dimension_numbers<[1], [0], [0], [1], [0, 0, 1, 1], [], []>} : vector<64x8xf32>, vector<8x8xf32>, vector<64x8xf32> -> vector<64x8xf32>
    %96 = arith.addf %90, %95 : vector<64x8xf32>
    %97 = vector.broadcast %41 : vector<1x8xf32> to vector<64x8xf32>
    %98 = arith.addf %96, %97 : vector<64x8xf32>
    %99 = vector.shape_cast %98 : vector<64x8xf32> to vector<1x8x8x8xf32>
    %c0_110 = arith.constant 0 : index
    %c0_111 = arith.constant 0 : index
    %c0_112 = arith.constant 0 : index
    %c0_113 = arith.constant 0 : index
    %100 = vector.load %arg9[%c0_110, %c0_111, %c0_112, %c0_113] : memref<1x8x8x8xf32, #tpu.memory_space<vmem>>, vector<1x8x8x8xf32>
    tpu.vector_store %arg9[%c0_110, %c0_111, %c0_112, %c0_113], %99 {strides = array<i32>} : memref<1x8x8x8xf32, #tpu.memory_space<vmem>>, vector<1x8x8x8xf32>,
    return
  }
  func.func @transform_0(%arg0: i32, %arg1: i32) -> (i32, i32, i32, i32) {
    %c0_i32 = arith.constant 0 : i32
    %c0_i32_0 = arith.constant 0 : i32
    %c0_i32_1 = arith.constant 0 : i32
    return %arg0, %arg1, %c0_i32, %c0_i32_0 : i32, i32, i32, i32
  }
  func.func @transform_1(%arg0: i32, %arg1: i32) -> (i32, i32, i32, i32) {
    %c8_i32 = arith.constant 8 : i32
    %0 = arith.muli %arg1, %c8_i32 : i32
    %c1_i32 = arith.constant 1 : i32
    %1 = arith.subi %0, %c1_i32 : i32
    %c0_i32 = arith.constant 0 : i32
    %2 = arith.maxsi %1, %c0_i32 : i32
    %c0_i32_0 = arith.constant 0 : i32
    %c0_i32_1 = arith.constant 0 : i32
    %c0_i32_2 = arith.constant 0 : i32
    return %arg0, %2, %c0_i32_0, %c0_i32_1 : i32, i32, i32, i32
  }
  func.func @transform_2(%arg0: i32, %arg1: i32) -> (i32, i32, i32, i32) {
    %c8_i32 = arith.constant 8 : i32
    %0 = arith.muli %arg1, %c8_i32 : i32
    %c8_i32_0 = arith.constant 8 : i32
    %1 = arith.addi %0, %c8_i32_0 : i32
    %c7_i32 = arith.constant 7 : i32
    %2 = arith.minsi %1, %c7_i32 : i32
    %c0_i32 = arith.constant 0 : i32
    %c0_i32_1 = arith.constant 0 : i32
    %c0_i32_2 = arith.constant 0 : i32
    return %arg0, %2, %c0_i32, %c0_i32_1 : i32, i32, i32, i32
  }
  func.func @transform_3(%arg0: i32, %arg1: i32) -> (i32, i32) {
    %c0_i32 = arith.constant 0 : i32
    %c0_i32_0 = arith.constant 0 : i32
    %c0_i32_1 = arith.constant 0 : i32
    return %c0_i32, %c0_i32_0 : i32, i32
  }
  func.func @transform_4(%arg0: i32, %arg1: i32) -> (i32, i32) {
    %c0_i32 = arith.constant 0 : i32
    %c0_i32_0 = arith.constant 0 : i32
    %c0_i32_1 = arith.constant 0 : i32
    return %c0_i32, %c0_i32_0 : i32, i32
  }
  func.func @transform_5(%arg0: i32, %arg1: i32) -> (i32, i32, i32, i32) {
    %c0_i32 = arith.constant 0 : i32
    %c0_i32_0 = arith.constant 0 : i32
    %c0_i32_1 = arith.constant 0 : i32
    %c0_i32_2 = arith.constant 0 : i32
    %c0_i32_3 = arith.constant 0 : i32
    return %c0_i32, %c0_i32_0, %c0_i32_1, %c0_i32_2 : i32, i32, i32, i32
  }
  func.func @transform_6(%arg0: i32, %arg1: i32) -> (i32, i32) {
    %c0_i32 = arith.constant 0 : i32
    %c0_i32_0 = arith.constant 0 : i32
    %c0_i32_1 = arith.constant 0 : i32
    return %c0_i32, %c0_i32_0 : i32, i32
  }
  func.func @transform_7(%arg0: i32, %arg1: i32) -> (i32, i32, i32, i32) {
    %c0_i32 = arith.constant 0 : i32
    %c0_i32_0 = arith.constant 0 : i32
    %c0_i32_1 = arith.constant 0 : i32
    return %arg0, %arg1, %c0_i32, %c0_i32_0 : i32, i32, i32, i32
  }
  func.func @transform_8(%arg0: i32, %arg1: i32) -> (i32, i32, i32, i32) {
    %c0_i32 = arith.constant 0 : i32
    %c0_i32_0 = arith.constant 0 : i32
    %c0_i32_1 = arith.constant 0 : i32
    return %arg0, %arg1, %c0_i32, %c0_i32_0 : i32, i32, i32, i32
  }
}

</mosaic_0001>

<bundles_post_ra>
// kernel: tpu_custom_call.1
= control target key start
LH: loop header
LB: loop body
LE: loop exit
PB: predicated region body
PF: predicated region fallthrough
CT: control target
= control target key end

     0   :  { %s3726_s0 = inlined_call_operand.hbm [shape: f32[2,8,8,8], index: 0, kind: input, shape index: {}]   ;;  %s3727_s1 = inlined_call_operand.hbm [shape: f32[2,8,8,8], index: 1, kind: input, shape index: {}]   ;;  %s3728_s2 = inlined_call_operand.hbm [shape: f32[2,8,8,8], index: 2, kind: input, shape index: {}]   ;;  %s3729_s3 = inlined_call_operand.hbm [shape: f32[8,8], index: 3, kind: input, shape index: {}]   ;;  %s3730_s4 = inlined_call_operand.vmem [shape: f32[1,8], index: 4, kind: input, shape index: {}]   ;;  %s3731_s5 = inlined_call_operand.hbm [shape: f32[3,3,8,8], index: 5, kind: input, shape index: {}]   ;;  %s3732_s6 = inlined_call_operand.vmem [shape: f32[1,8], index: 6, kind: input, shape index: {}]   ;;  %s3733_s7 = inlined_call_operand.hbm [shape: f32[2,8,8,8], index: 7, kind: output, shape index: {0}]   ;;  %s3734_s8 = inlined_call_operand.hbm [shape: f32[2,8,8,8], index: 8, kind: output, shape index: {1}]  }
   0x1   :  { %3751 = sst [smem:[#allocation30_spill]] %s3727_s1 }
   0x2   :  { %3752 = sst [smem:[#allocation31_spill]] %s3729_s3 }
   0x3   :  { %3753 = sst [smem:[#allocation32_spill]] %s3732_s6 }
   0x4   :  { %3754 = sst [smem:[#allocation33_spill]] %s3733_s7 }
   0x5   :  { %3755 = sst [smem:[#allocation34_spill]] %s3734_s8 }
   0x6   :  { %14 = vsyncpa [#allocation4], 0 }
   0x7   :  { %16 = vsyncpa [#allocation4 + $0x1], 0 }
   0x8   :  { %17 = vsyncpa [#allocation7], 0 }
   0x9   :  { %19 = vsyncpa [#allocation7 + $0x1], 0 }
   0xa   :  { %20 = vsyncpa [#allocation10], 0 }
   0xb   :  { %21 = vsyncpa [#allocation5], 0 }
   0xc   :  { %23 = vsyncpa [#allocation5 + $0x1], 0 }
   0xd   :  { %24 = vsyncpa [#allocation14], 0 }
   0xe   :  { %26 = vsyncpa [#allocation14 + $0x1], 0  ;;  %s3182_s27 = smov 0   ;;  %s3184_s28 = smov 0  }
   0xf   :  { %s3186_s29 = smov 0   ;;  %s3188_s30 = smov 0  }
  0x10   :  { %s3190_s9 = smov 0   ;;  %s3192_s10 = smov 0  }
  0x11 LB: > { %3756 = sst [smem:[#allocation20_spill]] %s3102_s27  ;;  %s3213_s11 = sadd.s32 4294967295, %s3122_s10   ;;  %s3122_s10 = sphi %s3192_s10, %s32_s10   ;;  %s3118_s9 = sphi %s3190_s9, %s3799_s9   ;;  %s3114_s30 = sphi %s3188_s30, %s3798_s30   ;;  %s3110_s29 = sphi %s3186_s29, %s3797_s29   ;;  %s3106_s28 = sphi %s3184_s28, %s3801_s28   ;;  %s3102_s27 = sphi %s3182_s27, %s3800_s27  }
  0x12   : > { %3757 = sst [smem:[#allocation21_spill]] %s3110_s29  ;;  %s2399_s12 = sadd.s32 4294967294, %s3122_s10  }
  0x13   : > { %3758 = sst [smem:[#allocation22_spill]] %s3118_s9  ;;  %p66_p0 = scmp.ne.s32.totalorder %s3106_s28, %s3102_s27 }
  0x14   : > { %3759 = sst [smem:[#allocation23_spill]] %s3122_s10  ;;  %p3741_p1 = scmp.eq.s32.totalorder %s3213_s11, 0 }
  0x15   : > { %p254_p3 = scmp.eq.s32.totalorder %s2399_s12, 1  ;;  %p2400_p5 = scmp.ge.s32.totalorder %s3122_s10, 1 }
  0x16   : > { %p3222_p4 = por %p3741_p1, %p66_p0  ;;  %p289_p7 = scmp.lt.s32.totalorder %s3122_s10, 3 }
  0x17   : > { %p3227_p6 = por %p254_p3, %p66_p0  ;;  %s3124_s16 = smov [#allocation9]  }
  0x18   : > { %s3760_s13 = scalar_select %p3222_p4, 1, 0 }
  0x19   : > { %s3761_s14 = scalar_select %p3227_p6, 1, 0 }
  0x1a   : > { %p3232_p8 = pnand %p2400_p5, %p289_p7  ;;  %s302_s17 = sshll.u32 %s3124_s16, 4  ;;  %s303_s17 = int_to_ptr.vmem [resolvable:$true] %s302_s17 }
  0x1b   : > { %3762 = sst [smem:[#allocation24_spill]] %s3761_s14  ;;  %s44_s19 = sadd.s32 1, %s3118_s9 }
  0x1c   : > { %s3763_s15 = scalar_select %p3232_p8, 1, 0 }
  0x1d   : > { %p2782_p10 = pneg %p3232_p8  ;;  %s53_s20 = sadd.s32 1, %s3110_s29 }
  0x1e   : > { %p46_p12 = scmp.ge.s32.totalorder %s44_s19, 2  ;;  %s2879_s21 = scalar_lea.vmem %s303_s17, 128 }
  0x1f   : > { %p3241_p11 = pnand %p2782_p10, %p3741_p1  ;;  %p2880_p0 = scmp.ne.s32.totalorder %s303_s17, %s2879_s21 }
  0x20   : > { %p2887_p7 = scmp.lt.s32.totalorder %s303_s17, %s303_s17  ;;  %p2888_p9 = scmp.lt.s32.totalorder %s2879_s21, %s2879_s21 }
  0x21   : > { %p3742_p13 = pneg %p3241_p11 }
  0x22   : > { %p2889_p2 = por %p2888_p9, %p2887_p7 }
  0x23   : > { %p2882_p3 = pnand %p2880_p0, %p3742_p13 }
  0x25   : > { %p2883_p5 = pneg %p2882_p3 }
  0x27   : > { %p2890_p10 = pnand %p2889_p2, %p2883_p5 }
  0x29   : > { %2893 = shalt.err (!%p2890_p10)
}
  0x2a   : > { %s3765_s3 = sld [smem:[#allocation31_spill]]  ;;  %s3803_s19 = smov (%p46_p12, %s44_s19), 0 }
  0x2b   : > { %3766 = sst [smem:[#allocation25_spill]] %s3803_s19  ;;  %p60_p2 = scmp.ne.s32.totalorder %s3110_s29, %s3106_s28 }
  0x2c   : > { %p61_p9 = scmp.eq.s32.totalorder %s3122_s10, 0  ;;  %s48_s24 = ssub.s32 %s3118_s9, %s3803_s19 }
  0x2d   : > { %p2808_p0 = scmp.lt.s32.totalorder %s3122_s10, 2  ;;  %p51_p3 = scmp.eq.s32.totalorder %s48_s24, 0 }
  0x2e   : > { %p62_p5 = por %p61_p9, %p60_p2  ;;  %p3767_p7 = scmp.eq.s32.totalorder %s3213_s11, 1 }
  0x2f   : > { %s3272_s26 = sand.u32 1, %s3110_s29   ;;  %s3278_s16 = sshll.u32 %s3118_s9, 10 }
  0x30   : > { %2785 = dma.hbm_to_vmem [thread:$0]  (!%p3241_p11), %s3765_s3, 128, %s303_s17, [#allocation10]  }
  0x31   : > { %p3267_p10 = por %p3767_p7, %p60_p2  ;;  %p3280_p12 = pnand %p2808_p0, %p62_p5 }
  0x32   : > { %s3275_s12 = scalar_select %p51_p3, %s3110_s29, %s53_s20  }
  0x33   : > { %s3768_s25 = scalar_select %p3267_p10, 1, 0 }
  0x34   : > { %3769 = sst [smem:[#allocation26_spill]] %s3275_s12  ;;  %s355_s24 = sand.u32 1, %s3122_s10  }
  0x35   : > { %s3747_s3 = sshll.u32 %s3272_s26, 3  ;;  %s3771_s1 = sld [smem:[#allocation30_spill]] }
  0x36   : > { %s359_s9 = scalar_lea.vmem [#allocation6], %s3747_s3  ;;  %s3125_s29 = smov [#allocation11]  }
  0x37   : > { %s372_s12 = sshll.u32 %s359_s9, 4  ;;  %s315_s27 = sshll.u32 %s3125_s29, 4  ;;  %s373_s12 = int_to_ptr.vmem [resolvable:$true] %s372_s12  ;;  %s316_s27 = int_to_ptr.vmem [resolvable:$true] %s315_s27 }
  0x38   : > { %s3296_s7 = scalar_lea.sflag [#allocation7], %s355_s24  ;;  %p3743_p2 = pneg %p3280_p12 }
  0x39   : > { %s2907_s21 = scalar_lea.vmem %s373_s12, 128  ;;  %s3126_s22 = smov [#allocation6]  }
  0x3a   : > { %p2908_p9 = scmp.ne.s32.totalorder %s373_s12, %s2907_s21  ;;  %s2912_s23 = sshll.u32 %s3126_s22, 4  ;;  %s2913_s23 = int_to_ptr.vmem [resolvable:$false] %s2912_s23 }
  0x3b   : > { %s370_s20 = scalar_lea.hbm %s3771_s1, %s3278_s16  ;;  %s2914_s14 = scalar_lea.vmem %s2913_s23, 256 }
  0x3c   : > { %p2910_p0 = pnand %p2908_p9, %p3743_p2  ;;  %p2915_p5 = scmp.lt.s32.totalorder %s373_s12, %s2913_s23 }
  0x3d   : > { %p2916_p7 = scmp.lt.s32.totalorder %s2914_s14, %s2907_s21 }
  0x3e   : > { %p2911_p3 = pneg %p2910_p0 }
  0x3f   : > { %p2917_p1 = por %p2916_p7, %p2915_p5 }
  0x41   : > { %p2918_p13 = pnand %p2917_p1, %p2911_p3 }
  0x43   : > { %2921 = shalt.err (!%p2918_p13)
}
  0x44   : > { %2795 = dma.hbm_to_vmem [thread:$0]  (!%p3280_p12), %s370_s20, 128, %s373_s12, %s3296_s7  }
  0x45   : > { %s2933_s29 = scalar_lea.vmem %s316_s27, 1152  ;;  %p3772_p9 = pneg %p3241_p11 }
  0x46   : > { %p2934_p6 = scmp.ne.s32.totalorder %s316_s27, %s2933_s29  ;;  %p2941_p10 = scmp.lt.s32.totalorder %s316_s27, %s316_s27 }
  0x47   : > { %p2942_p4 = scmp.lt.s32.totalorder %s2933_s29, %s2933_s29 }
  0x48   : > { %p2936_p0 = pnand %p2934_p6, %p3772_p9 }
  0x49   : > { %p2943_p8 = por %p2942_p4, %p2941_p10 }
  0x4a   : > { %p2937_p2 = pneg %p2936_p0 }
  0x4c   : > { %p2944_p5 = pnand %p2943_p8, %p2937_p2 }
  0x4e   : > { %2947 = shalt.err (!%p2944_p5)
}
  0x4f   : > { %s3127_s9 = smov 128   ;;  %s3128_s19 = smov 8  }
  0x50   : > { %2788 = dma.hbm_to_vmem [thread:$0]  (!%p3241_p11), %s3731_s5, 1152, %s316_s27, [#allocation10], %s3127_s9, %s3127_s9, %s3128_s19  }
  0x51   : > { %s2404_s24 = sshll.u32 %s3272_s26, 6  ;;  %s2516_s20 = sadd.s32 896, %s3278_s16 }
  0x52   : > { %s3322_s14 = scalar_lea.hbm %s3728_s2, %s2516_s20  ;;  %s336_s29 = scalar_lea.vmem [#allocation3], %s2404_s24 }
  0x53   : > { %s345_s3 = sshll.u32 %s336_s29, 4  ;;  %s3773_s1 = sshll.u32 %s3272_s26, 3  ;;  %s346_s3 = int_to_ptr.vmem [resolvable:$true] %s345_s3 }
  0x54   : > { %s383_s10 = scalar_lea.vmem [#allocation8], %s3773_s1  ;;  %s333_s18 = scalar_lea.sflag [#allocation4], %s3272_s26 }
  0x55   : > { %s396_s6 = sshll.u32 %s383_s10, 4  ;;  %s2961_s8 = scalar_lea.vmem %s346_s3, 1024  ;;  %s3326_s6 = int_to_ptr.vmem [resolvable:$true] %s396_s6 }
  0x56   : > { %p2962_p1 = scmp.ne.s32.totalorder %s346_s3, %s2961_s8  ;;  %p3774_p4 = pneg %p3280_p12 }
  0x57   : > { %s3129_s27 = smov [#allocation3]  }
  0x58   : > { %p2964_p6 = pnand %p2962_p1, %p3774_p4  ;;  %s2966_s12 = sshll.u32 %s3129_s27, 4  ;;  %s2967_s12 = int_to_ptr.vmem [resolvable:$false] %s2966_s12 }
  0x59   : > { %s2968_s23 = scalar_lea.vmem %s2967_s12, 2048  ;;  %p2969_p11 = scmp.lt.s32.totalorder %s346_s3, %s2967_s12 }
  0x5a   : > { %p2965_p8 = pneg %p2964_p6  ;;  %p2970_p13 = scmp.lt.s32.totalorder %s2968_s23, %s2961_s8 }
  0x5c   : > { %p2971_p10 = por %p2970_p13, %p2969_p11 }
  0x5e   : > { %p2972_p2 = pnand %p2971_p10, %p2965_p8 }
  0x60   : > { %2975 = shalt.err (!%p2972_p2)
}
  0x61   : > { %s3775_s26 = scalar_lea.hbm %s3726_s0, %s3278_s16  ;;  %s2989_s24 = scalar_lea.vmem %s3326_s6, 128 }
  0x62   : > { %2792 = dma.hbm_to_vmem [thread:$0]  (!%p3280_p12), %s3775_s26, 1024, %s346_s3, %s333_s18, %s3127_s9, %s3127_s9, %s3128_s19  }
  0x63   : > { %p2990_p3 = scmp.ne.s32.totalorder %s3326_s6, %s2989_s24  ;;  %p3776_p7 = pmov %p3774_p4 }
  0x64   : > { %s3130_s8 = smov [#allocation8]  }
  0x65   : > { %p2992_p9 = pnand %p2990_p3, %p3776_p7  ;;  %s2994_s20 = sshll.u32 %s3130_s8, 4  ;;  %s2995_s20 = int_to_ptr.vmem [resolvable:$false] %s2994_s20 }
  0x66   : > { %s2996_s21 = scalar_lea.vmem %s2995_s20, 256  ;;  %p2997_p5 = scmp.lt.s32.totalorder %s3326_s6, %s2995_s20 }
  0x67   : > { %p2993_p0 = pneg %p2992_p9  ;;  %p2998_p1 = scmp.lt.s32.totalorder %s2996_s21, %s2989_s24 }
  0x69   : > { %p2999_p4 = por %p2998_p1, %p2997_p5 }
  0x6b   : > { %p3000_p6 = pnand %p2999_p4, %p2993_p0 }
  0x6d   : > { %3003 = shalt.err (!%p3000_p6)
}
  0x6e   : > { %2798 = dma.hbm_to_vmem [thread:$0]  (!%p3280_p12), %s3322_s14, 128, %s3326_s6, %s3296_s7  }
  0x6f   : > { %p3777_p8 = scmp.ne.s32.totalorder %s3763_s15, 0 }
  0x71   : > { %405 = sbr.rel (%p3777_p8) target bundleno = 642 (0x282), region = 48 }
  0x76   : > { %s3356_s3 = sand.u32 1, %s3106_s28   ;;  %p3778_p11 = scmp.ne.s32.totalorder %s3760_s13, 0 }
  0x77   : > { %s3359_s16 = sshll.u32 %s3356_s3, 6  ;;  %s408_s9 = scalar_lea.sflag [#allocation4], %s3356_s3 }
  0x78   : > { %s3363_s19 = scalar_lea.vmem [#allocation3], %s3359_s16 }
  0x79   : > { %3081 = dma.done.wait (%p3778_p11), %s408_s9, 1024  }
  0x7a   : > { %3083 = vsyncadd (%p3778_p11), %s408_s9, 4294966272  ;;  %s416_s6 = sand.u32 1, %s3213_s11   ;;  %s2415_s7 = sshll.u32 %s3356_s3, 3 }
  0x7b   : > { %s417_s15 = scalar_lea.sflag [#allocation7], %s416_s6  ;;  %s3371_s17 = scalar_lea.vmem [#allocation6], %s2415_s7 }
  0x7c   : > { %3085 = dma.done.wait (%p3778_p11), %s417_s15, 256  }
  0x7d   : > { %3087 = vsyncadd (%p3778_p11), %s417_s15, 4294967040  ;;  %s429_s22 = scalar_lea.vmem [#allocation8], %s2415_s7  ;;  %p3779_p12 = scmp.eq.s32.totalorder %s3213_s11, 0 }
  0x7f   : > { %3089 = dma.done.wait (%p3779_p12), [#allocation10], 1280   ;;  %p3780_p13 = pmov %p3779_p12 }
  0x80   : > { %v3131_v0 = vmov 0.0   ;;  %vm3132_vm0 = vmmov 0   ;;  %vm518_vm1 = vcmask 64512   ;;  %v502_v1 = vld [vmem:[#allocation9] sm:$0xff]  ;;  %v505_v3 = vld [vmem:[%s3363_s19 + $0x8] sm:$0xff]  ;;  %v506_v4 = vld [vmem:[%s3363_s19 + $0x10] sm:$0xff] }
  0x81   : > { %3091 = vsyncadd (%p3780_p13), [#allocation10], 4294966016  ;;  %2633 = vmatprep.subr.mxu1 %v3131_v0  ;;  %2635 = vmatprep.mubr.msk.f32.mxu1 %vm3132_vm0, %v3131_v0  ;;  %v504_v2 = vld [vmem:[%s3363_s19] sm:$0xff]  ;;  %v722_v5 = vld [vmem:[%s429_s22] sm:$0xff]  ;;  %vm808_vm2 = vcmask 57344   ;;  %s3426_s14 = scalar_lea.vmem [#allocation13], %s3359_s16 }
  0x82   : > { %2614 = vmatprep.subr.mxu0 %v502_v1  ;;  %2616 = vmatprep.mubr.msk.f32.mxu0 %vm518_vm1, %v504_v2  ;;  %v507_v6 = vld [vmem:[%s3363_s19 + $0x18] sm:$0xff]  ;;  %v508_v7 = vld [vmem:[%s3363_s19 + $0x20] sm:$0xff]  ;;  %v509_v8 = vld [vmem:[%s3363_s19 + $0x28] sm:$0xff]  ;;  %809 = vst.msk [vmem:[#allocation2] sm:$0x1] %vm808_vm2, %v3131_v0  ;;  %s2517_s29 = sshll.u32 %s3114_s30, 10 }
  0x83   : > { %2615 = vmatpush3.msra.mxu0 %v502_v1  ;;  %2634 = vmatpush3.msra.mxu1 %v502_v1  ;;  %v510_v9 = vld [vmem:[%s3363_s19 + $0x30] sm:$0xff]  ;;  %v511_v10 = vld [vmem:[%s3363_s19 + $0x38] sm:$0xff]  ;;  %v648_v11 = vld [vmem:[%s3371_s17] sm:$0xff]  ;;  %810 = vst.msk [vmem:[#allocation2 + $0x10] sm:$0x1] %vm808_vm2, %v3131_v0  ;;  %s3781_s12 = sld [smem:[#allocation34_spill]] }
  0x84   : > { %2617 = vmatmul.mubr.msk.f32.vlgmr.msra.gmra.mxu0 %vm518_vm1, %v505_v3  ;;  %2628 = vmatprep.subr.mxu0 %v3131_v0  ;;  %811 = vst.msk [vmem:[#allocation2 + $0x20] sm:$0x1] %vm808_vm2, %v3131_v0  ;;  %812 = vst.msk [vmem:[#allocation2 + $0x30] sm:$0x1] %vm808_vm2, %v3131_v0  ;;  %v860_v12 = vld [vmem:[#allocation11 + $0x8] sm:$0xff]  ;;  %v850_v13 = vld [vmem:[#allocation11] sm:$0xff] }
  0x85   : > { %2629 = vmatpush3.msra.mxu0 %v502_v1  ;;  %2619 = vmatprep.mubr.msk.f32.mxu0 %vm518_vm1, %v506_v4  ;;  %813 = vst.msk [vmem:[#allocation2 + $0x40] sm:$0x1] %vm808_vm2, %v3131_v0  ;;  %814 = vst.msk [vmem:[#allocation2 + $0x50] sm:$0x1] %vm808_vm2, %v3131_v0  ;;  %v1128_v14 = vld [vmem:[#allocation11 + $0x10] sm:$0xff]  ;;  %v1275_v15 = vld [vmem:[#allocation11 + $0x18] sm:$0xff] }
  0x86   : > { %2636 = vmatmul.mubr.msk.f32.vlgmr.msra.gmra.mxu1 %vm518_vm1, %v722_v5  ;;  %815 = vst.msk [vmem:[#allocation2 + $0x60] sm:$0x1] %vm808_vm2, %v3131_v0  ;;  %816 = vst.msk [vmem:[#allocation2 + $0x70] sm:$0x1] %vm808_vm2, %v3131_v0  ;;  %2638 = vmatprep.subr.mxu1 %v860_v12  ;;  %v2421_v16 = vld [vmem:[%s3730_s4] ss:$0 sm:$0xff] }
  0x87   : > { %817 = vst.msk [vmem:[#allocation2 + $0x80] sm:$0x1] %vm808_vm2, %v3131_v0  ;;  %818 = vst.msk [vmem:[#allocation2 + $0x90] sm:$0x1] %vm808_vm2, %v3131_v0  ;;  %2652 = vmatprep.subr.mxu0 %v850_v13  ;;  %2639 = vmatpush3.msra.mxu1 %v860_v12  ;;  %v1422_v45 = vld [vmem:[#allocation11 + $0x20] sm:$0xff]  ;;  %v1569_v48 = vld [vmem:[#allocation11 + $0x28] sm:$0xff] }
  0x88   : > { %2620 = vmatmul.mubr.msk.f32.gmra.mxu0 %vm518_vm1, %v507_v6  ;;  %819 = vst.msk [vmem:[#allocation2 + $0x9] sm:$0x1] %vm808_vm2, %v3131_v0  ;;  %820 = vst.msk [vmem:[#allocation2 + $0x19] sm:$0x1] %vm808_vm2, %v3131_v0  ;;  %2666 = vmatprep.subr.mxu1 %v1128_v14  ;;  %v1717_v62 = vld [vmem:[#allocation11 + $0x30] sm:$0xff]  ;;  %v1864_v63 = vld [vmem:[#allocation11 + $0x38] sm:$0xff] }
  0x89   : > { %2622 = vmatprep.mubr.msk.f32.mxu0 %vm518_vm1, %v508_v7  ;;  %821 = vst.msk [vmem:[#allocation2 + $0x29] sm:$0x1] %vm808_vm2, %v3131_v0  ;;  %822 = vst.msk [vmem:[#allocation2 + $0x39] sm:$0x1] %vm808_vm2, %v3131_v0  ;;  %v2011_v6 = vld [vmem:[#allocation11 + $0x40] sm:$0xff]  ;;  %s3601_s23 = scalar_lea.hbm %s3781_s12, %s2517_s29  ;;  %s2210_s1 = sshll.u32 %s3426_s14, 4  ;;  %s3604_s1 = int_to_ptr.vmem [resolvable:$true] %s2210_s1 }
  0x8a   : > { %823 = vst.msk [vmem:[#allocation2 + $0x49] sm:$0x1] %vm808_vm2, %v3131_v0  ;;  %824 = vst.msk [vmem:[#allocation2 + $0x59] sm:$0x1] %vm808_vm2, %v3131_v0  ;;  %s2177_s10 = scalar_lea.sflag [#allocation14], %s3356_s3  ;;  %s3004_s26 = scalar_lea.vmem %s3604_s1, 1024 }
  0x8b   : > { %825 = vst.msk [vmem:[#allocation2 + $0x69] sm:$0x1] %vm808_vm2, %v3131_v0  ;;  %826 = vst.msk [vmem:[#allocation2 + $0x79] sm:$0x1] %vm808_vm2, %v3131_v0  ;;  %p3005_p10 = scmp.ne.s32.totalorder %s3604_s1, %s3004_s26  ;;  %p3782_p2 = scmp.ne.s32.totalorder %s3768_s25, 0 }
  0x8c   : > { %2623 = vmatmul.mubr.msk.f32.gmra.mxu0 %vm518_vm1, %v509_v8  ;;  %827 = vst.msk [vmem:[#allocation2 + $0x89] sm:$0x1] %vm808_vm2, %v3131_v0  ;;  %828 = vst.msk [vmem:[#allocation2 + $0x99] sm:$0x1] %vm808_vm2, %v3131_v0  ;;  %s3133_s24 = smov [#allocation13]  }
  0x8d   : > { %2625 = vmatprep.mubr.msk.f32.mxu0 %vm518_vm1, %v510_v9  ;;  %p3006_p3 = pnand %p3005_p10, %p3782_p2  ;;  %s3008_s8 = sshll.u32 %s3133_s24, 4  ;;  %s3009_s8 = int_to_ptr.vmem [resolvable:$false] %s3008_s8 }
  0x8e   : > { %s3010_s20 = scalar_lea.vmem %s3009_s8, 2048  ;;  %p3011_p9 = scmp.lt.s32.totalorder %s3604_s1, %s3009_s8 }
  0x8f   : > { %p3007_p7 = pneg %p3006_p3  ;;  %p3012_p0 = scmp.lt.s32.totalorder %s3010_s20, %s3004_s26 }
  0x90   : > { %2626 = vmatmul.mubr.msk.f32.gmra.mxu0 %vm518_vm1, %v511_v10 }
  0x91   : > { %2630 = vmatprep.mubr.msk.f32.mxu0 %vm3132_vm0, %v3131_v0  ;;  %p3013_p5 = por %p3012_p0, %p3011_p9 }
  0x93   : > { %p3014_p1 = pnand %p3013_p5, %p3007_p7 }
  0x94   : > { %2631 = vmatmul.mubr.msk.f32.vlgmr.msra.gmra.mxu0 %vm518_vm1, %v648_v11 }
  0x95   : > { %2653 = vmatpush3.msra.mxu0 %v850_v13 }
  0x96   : > { %2680 = vmatprep.subr.mxu0 %v1275_v15 }
 0x144   : > { %v2618_v17 = vpop.f32.mrf.mxu0 }
 0x145   : > { %v615_v18 = vadd.f32 %v2618_v17, %v2421_v16 }
 0x146   : > { %v609_v19 = vpop.f32.mrf.mxu0  ;;  %v792_v20 = vpop.f32.mrf.mxu1 }
 0x147   : > { %801 = vst.msk [vmem:[%s3426_s14 + $0x8] sm:$0xff] %vm518_vm1, %v615_v18  ;;  %834 = vst.msk [vmem:[#allocation2 + $0x21] sm:$0xff] %vm518_vm1, %v615_v18  ;;  %v610_v21 = vadd.f32 %v2421_v16, %v609_v19  ;;  %v793_v22 = vadd.f32 %v2421_v16, %v792_v20 }
 0x148   : > { %v2621_v23 = vpop.f32.mrf.mxu0  ;;  %v2637_v24 = vpop.f32.mrf.mxu1 }
 0x149   : > { %800 = vst.msk [vmem:[%s3426_s14] sm:$0xff] %vm518_vm1, %v610_v21  ;;  %833 = vst.msk [vmem:[#allocation2 + $0x11] sm:$0xff] %vm518_vm1, %v610_v21  ;;  %v625_v25 = vadd.f32 %v2621_v23, %v2421_v16  ;;  %v799_v26 = vmul.f32 0.0, %v793_v22 }
 0x14a   : > { %v619_v27 = vpop.f32.mrf.mxu0 }
 0x14b   : > { %803 = vst.msk [vmem:[%s3426_s14 + $0x18] sm:$0xff] %vm518_vm1, %v625_v25  ;;  %836 = vst.msk [vmem:[#allocation2 + $0x41] sm:$0xff] %vm518_vm1, %v625_v25  ;;  %v620_v28 = vadd.f32 %v2421_v16, %v619_v27 }
 0x14c   : > { %831 = vst.msk [vmem:[#allocation2 + $0x91] sm:$0xff] %vm518_vm1, %v799_v26  ;;  %v2624_v29 = vpop.f32.mrf.mxu0 }
 0x14d   : > { %802 = vst.msk [vmem:[%s3426_s14 + $0x10] sm:$0xff] %vm518_vm1, %v620_v28  ;;  %835 = vst.msk [vmem:[#allocation2 + $0x31] sm:$0xff] %vm518_vm1, %v620_v28  ;;  %v635_v30 = vadd.f32 %v2624_v29, %v2421_v16 }
 0x14e   : > { %v629_v31 = vpop.f32.mrf.mxu0  ;;  %v3461_v46 = vld [vmem:[#allocation2 + $0x21] sm:$0xff] }
 0x14f   : > { %805 = vst.msk [vmem:[%s3426_s14 + $0x28] sm:$0xff] %vm518_vm1, %v635_v30  ;;  %838 = vst.msk [vmem:[#allocation2 + $0x61] sm:$0xff] %vm518_vm1, %v635_v30  ;;  %v630_v32 = vadd.f32 %v2421_v16, %v629_v31  ;;  %v3463_v47 = vld [vmem:[#allocation2 + $0x20] sm:$0xff] }
 0x150   : > { %v2627_v33 = vpop.f32.mrf.mxu0  ;;  %v3456_v43 = vld [vmem:[#allocation2 + $0x11] sm:$0xff]  ;;  %v3514_v61 = vld [vmem:[#allocation2 + $0x22] sm:$0xff] }
 0x151   : > { %804 = vst.msk [vmem:[%s3426_s14 + $0x20] sm:$0xff] %vm518_vm1, %v630_v32  ;;  %837 = vst.msk [vmem:[#allocation2 + $0x51] sm:$0xff] %vm518_vm1, %v630_v32  ;;  %v645_v34 = vadd.f32 %v2627_v33, %v2421_v16  ;;  %v843_v44 = vld [vmem:[#allocation2 + $0x10] sm:$0xff] }
 0x152   : > { %v639_v35 = vpop.f32.mrf.mxu0  ;;  %v3477_v51 = vld [vmem:[#allocation2 + $0x41] sm:$0xff]  ;;  %v1120_v60 = vld [vmem:[#allocation2 + $0x12] sm:$0xff] }
 0x153   : > { %807 = vst.msk [vmem:[%s3426_s14 + $0x38] sm:$0xff] %vm518_vm1, %v645_v34  ;;  %840 = vst.msk [vmem:[#allocation2 + $0x81] sm:$0xff] %vm518_vm1, %v645_v34  ;;  %v640_v36 = vadd.f32 %v2421_v16, %v639_v35  ;;  %v3479_v52 = vld [vmem:[#allocation2 + $0x40] sm:$0xff]  ;;  %v1715_v9 = vld [vmem:[#allocation2 + $0x90] sm:$0xff] }
 0x154   : > { %v718_v37 = vpop.f32.mrf.mxu0  ;;  %v3469_v49 = vld [vmem:[#allocation2 + $0x31] sm:$0xff]  ;;  %v1123_v1 = vld [vmem:[#allocation2 + $0x42] sm:$0xff] }
 0x155   : > { %806 = vst.msk [vmem:[%s3426_s14 + $0x30] sm:$0xff] %vm518_vm1, %v640_v36  ;;  %839 = vst.msk [vmem:[#allocation2 + $0x71] sm:$0xff] %vm518_vm1, %v640_v36  ;;  %v719_v38 = vadd.f32 %v2421_v16, %v718_v37  ;;  %v3471_v50 = vld [vmem:[#allocation2 + $0x30] sm:$0xff] }
 0x156   : > { %v2632_v39 = vpop.f32.mrf.mxu0  ;;  %v3493_v55 = vld [vmem:[#allocation2 + $0x61] sm:$0xff]  ;;  %v1122_v0 = vld [vmem:[#allocation2 + $0x32] sm:$0xff] }
 0x157   : > { %v797_v40 = vmul.f32 0.0, %v719_v38  ;;  %v3495_v56 = vld [vmem:[#allocation2 + $0x60] sm:$0xff]  ;;  %v1862_v10 = vld [vmem:[#allocation2 + $0x91] sm:$0xff] }
 0x158   : > { %v3485_v53 = vld [vmem:[#allocation2 + $0x51] sm:$0xff]  ;;  %v1125_v3 = vld [vmem:[#allocation2 + $0x62] sm:$0xff] }
 0x159   : > { %829 = vst.msk [vmem:[#allocation2 + $0x1] sm:$0xff] %vm518_vm1, %v797_v40  ;;  %v3487_v54 = vld [vmem:[#allocation2 + $0x50] sm:$0xff] }
 0x15a   : > { %v1124_v2 = vld [vmem:[#allocation2 + $0x52] sm:$0xff]  ;;  %v1273_v5 = vld [vmem:[#allocation2 + $0x80] sm:$0xff] }
 0x15b   : > { %v1420_v7 = vld [vmem:[#allocation2 + $0x81] sm:$0xff]  ;;  %v2009_v11 = vld [vmem:[#allocation2 + $0x92] sm:$0xff] }
 0x15c   : > { %v3501_v57 = vld [vmem:[#allocation2 + $0x71] sm:$0xff]  ;;  %v1567_v8 = vld [vmem:[#allocation2 + $0x82] sm:$0xff] }
 0x15d   : > { %v3503_v58 = vld [vmem:[#allocation2 + $0x70] sm:$0xff] }
 0x15e   : > { %v1126_v4 = vld [vmem:[#allocation2 + $0x72] sm:$0xff] }
 0x160   : > { %v851_v41 = vld [vmem:[#allocation2 + $0x1] sm:$0xff] }
 0x161   : > { %v842_v42 = vld [vmem:[#allocation2] sm:$0xff]  ;;  %2640 = vmatprep.mubr.msk.f32.mxu1 %vm518_vm1, %v851_v41 }
 0x162   : > { %2654 = vmatprep.mubr.msk.f32.mxu0 %vm518_vm1, %v842_v42  ;;  %2641 = vmatmul.mubr.msk.f32.vlgmr.msra.gmra.mxu1 %vm518_vm1, %v3456_v43  ;;  %v1119_v59 = vld [vmem:[#allocation2 + $0x2] sm:$0xff] }
 0x163   : > { %2655 = vmatmul.mubr.msk.f32.vlgmr.msra.gmra.mxu0 %vm518_vm1, %v843_v44  ;;  %2643 = vmatprep.mubr.msk.f32.mxu1 %vm518_vm1, %v3461_v46 }
 0x164   : > { %2657 = vmatprep.mubr.msk.f32.mxu0 %vm518_vm1, %v3463_v47  ;;  %2667 = vmatpush3.msra.mxu1 %v1128_v14 }
 0x165   : > { %2681 = vmatpush3.msra.mxu0 %v1275_v15  ;;  %2694 = vmatprep.subr.mxu1 %v1422_v45 }
 0x166   : > { %2708 = vmatprep.subr.mxu0 %v1569_v48  ;;  %2644 = vmatmul.mubr.msk.f32.gmra.mxu1 %vm518_vm1, %v3469_v49 }
 0x167   : > { %2658 = vmatmul.mubr.msk.f32.gmra.mxu0 %vm518_vm1, %v3471_v50  ;;  %2646 = vmatprep.mubr.msk.f32.mxu1 %vm518_vm1, %v3477_v51 }
 0x168   : > { %2660 = vmatprep.mubr.msk.f32.mxu0 %vm518_vm1, %v3479_v52 }
 0x16a   : > { %2647 = vmatmul.mubr.msk.f32.gmra.mxu1 %vm518_vm1, %v3485_v53 }
 0x16b   : > { %2661 = vmatmul.mubr.msk.f32.gmra.mxu0 %vm518_vm1, %v3487_v54  ;;  %2649 = vmatprep.mubr.msk.f32.mxu1 %vm518_vm1, %v3493_v55 }
 0x16c   : > { %2663 = vmatprep.mubr.msk.f32.mxu0 %vm518_vm1, %v3495_v56 }
 0x16e   : > { %2650 = vmatmul.mubr.msk.f32.gmra.mxu1 %vm518_vm1, %v3501_v57 }
 0x16f   : > { %2664 = vmatmul.mubr.msk.f32.gmra.mxu0 %vm518_vm1, %v3503_v58  ;;  %2668 = vmatprep.mubr.msk.f32.mxu1 %vm518_vm1, %v1119_v59 }
 0x170   : > { %2682 = vmatprep.mubr.msk.f32.mxu0 %vm518_vm1, %v843_v44 }
 0x172   : > { %2669 = vmatmul.mubr.msk.f32.vlgmr.msra.gmra.mxu1 %vm518_vm1, %v1120_v60 }
 0x173   : > { %2683 = vmatmul.mubr.msk.f32.vlgmr.msra.gmra.mxu0 %vm518_vm1, %v3463_v47  ;;  %2671 = vmatprep.mubr.msk.f32.mxu1 %vm518_vm1, %v3514_v61 }
 0x174   : > { %2685 = vmatprep.mubr.msk.f32.mxu0 %vm518_vm1, %v3471_v50  ;;  %2695 = vmatpush3.msra.mxu1 %v1422_v45 }
 0x175   : > { %2709 = vmatpush3.msra.mxu0 %v1569_v48  ;;  %2722 = vmatprep.subr.mxu1 %v1717_v62 }
 0x176   : > { %2736 = vmatprep.subr.mxu0 %v1864_v63  ;;  %2672 = vmatmul.mubr.msk.f32.gmra.mxu1 %vm518_vm1, %v1122_v0 }
 0x177   : > { %2686 = vmatmul.mubr.msk.f32.gmra.mxu0 %vm518_vm1, %v3479_v52  ;;  %2674 = vmatprep.mubr.msk.f32.mxu1 %vm518_vm1, %v1123_v1 }
 0x178   : > { %2688 = vmatprep.mubr.msk.f32.mxu0 %vm518_vm1, %v3487_v54 }
 0x17a   : > { %2675 = vmatmul.mubr.msk.f32.gmra.mxu1 %vm518_vm1, %v1124_v2 }
 0x17b   : > { %2689 = vmatmul.mubr.msk.f32.gmra.mxu0 %vm518_vm1, %v3495_v56  ;;  %2677 = vmatprep.mubr.msk.f32.mxu1 %vm518_vm1, %v1125_v3 }
 0x17c   : > { %2691 = vmatprep.mubr.msk.f32.mxu0 %vm518_vm1, %v3503_v58 }
 0x17e   : > { %2678 = vmatmul.mubr.msk.f32.gmra.mxu1 %vm518_vm1, %v1126_v4 }
 0x17f   : > { %2692 = vmatmul.mubr.msk.f32.gmra.mxu0 %vm518_vm1, %v1273_v5  ;;  %2696 = vmatprep.mubr.msk.f32.mxu1 %vm518_vm1, %v3456_v43 }
 0x180   : > { %2710 = vmatprep.mubr.msk.f32.mxu0 %vm518_vm1, %v1120_v60 }
 0x182   : > { %2697 = vmatmul.mubr.msk.f32.vlgmr.msra.gmra.mxu1 %vm518_vm1, %v3461_v46 }
 0x183   : > { %2711 = vmatmul.mubr.msk.f32.vlgmr.msra.gmra.mxu0 %vm518_vm1, %v3514_v61  ;;  %2699 = vmatprep.mubr.msk.f32.mxu1 %vm518_vm1, %v3469_v49 }
 0x184   : > { %2713 = vmatprep.mubr.msk.f32.mxu0 %vm518_vm1, %v1122_v0  ;;  %2723 = vmatpush3.msra.mxu1 %v1717_v62 }
 0x185   : > { %2737 = vmatpush3.msra.mxu0 %v1864_v63  ;;  %2750 = vmatprep.subr.mxu1 %v2011_v6 }
 0x186   : > { %2700 = vmatmul.mubr.msk.f32.gmra.mxu1 %vm518_vm1, %v3477_v51 }
 0x187   : > { %2714 = vmatmul.mubr.msk.f32.gmra.mxu0 %vm518_vm1, %v1123_v1  ;;  %2702 = vmatprep.mubr.msk.f32.mxu1 %vm518_vm1, %v3485_v53 }
 0x188   : > { %2716 = vmatprep.mubr.msk.f32.mxu0 %vm518_vm1, %v1124_v2 }
 0x18a   : > { %2703 = vmatmul.mubr.msk.f32.gmra.mxu1 %vm518_vm1, %v3493_v55 }
 0x18b   : > { %2717 = vmatmul.mubr.msk.f32.gmra.mxu0 %vm518_vm1, %v1125_v3  ;;  %2705 = vmatprep.mubr.msk.f32.mxu1 %vm518_vm1, %v3501_v57 }
 0x18c   : > { %2719 = vmatprep.mubr.msk.f32.mxu0 %vm518_vm1, %v1126_v4 }
 0x18e   : > { %2706 = vmatmul.mubr.msk.f32.gmra.mxu1 %vm518_vm1, %v1420_v7 }
 0x18f   : > { %2720 = vmatmul.mubr.msk.f32.gmra.mxu0 %vm518_vm1, %v1567_v8  ;;  %2724 = vmatprep.mubr.msk.f32.mxu1 %vm518_vm1, %v3463_v47 }
 0x190   : > { %2738 = vmatprep.mubr.msk.f32.mxu0 %vm518_vm1, %v3461_v46 }
 0x192   : > { %2725 = vmatmul.mubr.msk.f32.vlgmr.msra.gmra.mxu1 %vm518_vm1, %v3471_v50 }
 0x193   : > { %2739 = vmatmul.mubr.msk.f32.vlgmr.msra.gmra.mxu0 %vm518_vm1, %v3469_v49  ;;  %2727 = vmatprep.mubr.msk.f32.mxu1 %vm518_vm1, %v3479_v52 }
 0x194   : > { %2741 = vmatprep.mubr.msk.f32.mxu0 %vm518_vm1, %v3477_v51  ;;  %2751 = vmatpush3.msra.mxu1 %v2011_v6 }
 0x196   : > { %2728 = vmatmul.mubr.msk.f32.gmra.mxu1 %vm518_vm1, %v3487_v54 }
 0x197   : > { %2742 = vmatmul.mubr.msk.f32.gmra.mxu0 %vm518_vm1, %v3485_v53  ;;  %2730 = vmatprep.mubr.msk.f32.mxu1 %vm518_vm1, %v3495_v56 }
 0x198   : > { %2744 = vmatprep.mubr.msk.f32.mxu0 %vm518_vm1, %v3493_v55 }
 0x19a   : > { %2731 = vmatmul.mubr.msk.f32.gmra.mxu1 %vm518_vm1, %v3503_v58 }
 0x19b   : > { %2745 = vmatmul.mubr.msk.f32.gmra.mxu0 %vm518_vm1, %v3501_v57  ;;  %2733 = vmatprep.mubr.msk.f32.mxu1 %vm518_vm1, %v1273_v5 }
 0x19c   : > { %2747 = vmatprep.mubr.msk.f32.mxu0 %vm518_vm1, %v1420_v7 }
 0x19e   : > { %2734 = vmatmul.mubr.msk.f32.gmra.mxu1 %vm518_vm1, %v1715_v9 }
 0x19f   : > { %2748 = vmatmul.mubr.msk.f32.gmra.mxu0 %vm518_vm1, %v1862_v10  ;;  %2752 = vmatprep.mubr.msk.f32.mxu1 %vm518_vm1, %v3514_v61 }
 0x1a2   : > { %2753 = vmatmul.mubr.msk.f32.vlgmr.msra.gmra.mxu1 %vm518_vm1, %v1122_v0 }
 0x1a3   : > { %2755 = vmatprep.mubr.msk.f32.mxu1 %vm518_vm1, %v1123_v1 }
 0x1a6   : > { %2756 = vmatmul.mubr.msk.f32.gmra.mxu1 %vm518_vm1, %v1124_v2 }
 0x1a7   : > { %2758 = vmatprep.mubr.msk.f32.mxu1 %vm518_vm1, %v1125_v3 }
 0x1aa   : > { %2759 = vmatmul.mubr.msk.f32.gmra.mxu1 %vm518_vm1, %v1126_v4 }
 0x1ab   : > { %2761 = vmatprep.mubr.msk.f32.mxu1 %vm518_vm1, %v1567_v8 }
 0x1ae   : > { %2762 = vmatmul.mubr.msk.f32.gmra.mxu1 %vm518_vm1, %v2009_v11 }
 0x1af   : > { %3017 = shalt.err (!%p3014_p1)
}
 0x1b0   : > { %s3018_s21 = scalar_lea.hbm %s3601_s23, 1024  ;;  %s3022_s6 = scalar_lea.hbm %s3781_s12, 2048 }
 0x1b1   : > { %p3019_p4 = scmp.ne.s32.totalorder %s3601_s23, %s3018_s21  ;;  %p3023_p11 = scmp.lt.s32.totalorder %s3601_s23, %s3781_s12 }
 0x1b2   : > { %p3024_p12 = scmp.lt.s32.totalorder %s3022_s6, %s3018_s21 }
 0x1b3   : > { %p3020_p6 = pnand %p3019_p4, %p3782_p2 }
 0x1b4   : > { %p3025_p13 = por %p3024_p12, %p3023_p11 }
 0x1b5   : > { %p3021_p8 = pneg %p3020_p6 }
 0x1b7   : > { %p3026_p10 = pnand %p3025_p13, %p3021_p8 }
 0x1b9   : > { %3029 = shalt.err (!%p3026_p10)
}
 0x1ba   : > { %s3134_s17 = smov 128   ;;  %s3135_s22 = smov 8  }
 0x1bb   : > { %2779 = dma.vmem_to_hbm [thread:$0]  (%p3782_p2), %s3604_s1, 1024, %s3601_s23, %s2177_s10, %s3134_s17, %s3134_s17, %s3135_s22  }
 0x1bc   : > { %s3786_s14 = sld [smem:[#allocation32_spill]]  ;;  %s3650_s18 = scalar_lea.vmem [#allocation12], %s3359_s16 }
 0x1bd   : > { %s2192_s16 = sshll.u32 %s3650_s18, 4  ;;  %s3790_s1 = sld [smem:[#allocation33_spill]]  ;;  %s3675_s16 = int_to_ptr.vmem [resolvable:$true] %s2192_s16 }
 0x1be   : > { %s2172_s26 = scalar_lea.sflag [#allocation5], %s3356_s3  ;;  %s3030_s24 = scalar_lea.vmem %s3675_s16, 1024 }
 0x1bf   : > { %p3031_p3 = scmp.ne.s32.totalorder %s3675_s16, %s3030_s24  ;;  %s3136_s8 = smov [#allocation12]  }
 0x1c0   : > { %s3034_s30 = sshll.u32 %s3136_s8, 4  ;;  %s3035_s30 = int_to_ptr.vmem [resolvable:$false] %s3034_s30 }
 0x1c1   : > { %p3032_p7 = pnand %p3031_p3, %p3782_p2  ;;  %s3036_s20 = scalar_lea.vmem %s3035_s30, 2048 }
 0x1c2   : > { %p3037_p0 = scmp.lt.s32.totalorder %s3675_s16, %s3035_s30  ;;  %p3038_p5 = scmp.lt.s32.totalorder %s3036_s20, %s3030_s24 }
 0x1c3   : > { %s3673_s10 = scalar_lea.hbm %s3790_s1, %s2517_s29  ;;  %p3033_p9 = pneg %p3032_p7 }
 0x1c4   : > { %p3039_p1 = por %p3038_p5, %p3037_p0 }
 0x1c6   : > { %p3040_p4 = pnand %p3039_p1, %p3033_p9 }
 0x222   : > { %v2642_v12 = vpop.f32.mrf.mxu1 }
 0x223   : > { %v2656_v13 = vpop.f32.mrf.mxu0 }
 0x224   : > { %v951_v14 = vpop.f32.mrf.mxu1  ;;  %v1086_v58 = vadd.f32 %v2656_v13, %v2642_v12 }
 0x225   : > { %v1080_v15 = vpop.f32.mrf.mxu0 }
 0x226   : > { %v2645_v16 = vpop.f32.mrf.mxu1  ;;  %v1081_v61 = vadd.f32 %v1080_v15, %v951_v14 }
 0x227   : > { %v2659_v17 = vpop.f32.mrf.mxu0 }
 0x228   : > { %v961_v18 = vpop.f32.mrf.mxu1  ;;  %v1096_v1 = vadd.f32 %v2659_v17, %v2645_v16 }
 0x229   : > { %v1090_v19 = vpop.f32.mrf.mxu0 }
 0x22a   : > { %v2648_v20 = vpop.f32.mrf.mxu1  ;;  %v1091_v4 = vadd.f32 %v1090_v19, %v961_v18 }
 0x22b   : > { %v2662_v21 = vpop.f32.mrf.mxu0 }
 0x22c   : > { %v971_v22 = vpop.f32.mrf.mxu1  ;;  %v1106_v9 = vadd.f32 %v2662_v21, %v2648_v20 }
 0x22d   : > { %v1100_v23 = vpop.f32.mrf.mxu0 }
 0x22e   : > { %v2651_v24 = vpop.f32.mrf.mxu1  ;;  %v1101_v12 = vadd.f32 %v1100_v23, %v971_v22 }
 0x22f   : > { %v2665_v25 = vpop.f32.mrf.mxu0 }
 0x230   : > { %v3632_v26 = vpop.f32.mrf.mxu1  ;;  %v1116_v15 = vadd.f32 %v2665_v25, %v2651_v24 }
 0x231   : > { %v1110_v27 = vpop.f32.mrf.mxu0 }
 0x232   : > { %v2670_v28 = vpop.f32.mrf.mxu1  ;;  %v1111_v19 = vadd.f32 %v1110_v27, %v3632_v26 }
 0x233   : > { %v2684_v29 = vpop.f32.mrf.mxu0  ;;  %v1259_v62 = vadd.f32 %v2670_v28, %v1086_v58 }
 0x234   : > { %v1219_v30 = vpop.f32.mrf.mxu1 }
 0x235   : > { %v1366_v31 = vpop.f32.mrf.mxu0  ;;  %v1258_v2 = vadd.f32 %v1219_v30, %v1081_v61  ;;  %v1406_v5 = vadd.f32 %v2684_v29, %v1259_v62 }
 0x236   : > { %v2673_v32 = vpop.f32.mrf.mxu1 }
 0x237   : > { %v2687_v33 = vpop.f32.mrf.mxu0  ;;  %v1261_v6 = vadd.f32 %v2673_v32, %v1096_v1  ;;  %v1405_v10 = vadd.f32 %v1366_v31, %v1258_v2 }
 0x238   : > { %v1229_v34 = vpop.f32.mrf.mxu1 }
 0x239   : > { %v1376_v35 = vpop.f32.mrf.mxu0  ;;  %v1260_v11 = vadd.f32 %v1229_v34, %v1091_v4 }
 0x23a   : > { %v2676_v36 = vpop.f32.mrf.mxu1 }
 0x23b   : > { %v2690_v37 = vpop.f32.mrf.mxu0  ;;  %v1407_v17 = vadd.f32 %v1376_v35, %v1260_v11 }
 0x23c   : > { %v1239_v38 = vpop.f32.mrf.mxu1 }
 0x23d   : > { %v1386_v39 = vpop.f32.mrf.mxu0  ;;  %v1262_v28 = vadd.f32 %v1239_v38, %v1101_v12 }
 0x23e   : > { %v2679_v40 = vpop.f32.mrf.mxu1 }
 0x23f   : > { %v2693_v41 = vpop.f32.mrf.mxu0  ;;  %v1265_v29 = vadd.f32 %v2679_v40, %v1116_v15  ;;  %v1409_v22 = vadd.f32 %v1386_v39, %v1262_v28  ;;  %v2504_v39 = vld [vmem:[%s3786_s14] ss:$0 sm:$0xff] }
 0x240   : > { %v1249_v42 = vpop.f32.mrf.mxu1 }
 0x241   : > { %v3634_v43 = vpop.f32.mrf.mxu0  ;;  %v1264_v23 = vadd.f32 %v1249_v42, %v1111_v19  ;;  %v1412_v38 = vadd.f32 %v2693_v41, %v1265_v29 }
 0x242   : > { %v2698_v44 = vpop.f32.mrf.mxu1 }
 0x243   : > { %v2712_v45 = vpop.f32.mrf.mxu0  ;;  %v1411_v26 = vadd.f32 %v3634_v43, %v1264_v23 }
 0x244   : > { %v1513_v46 = vpop.f32.mrf.mxu1 }
 0x245   : > { %v1660_v47 = vpop.f32.mrf.mxu0  ;;  %v1552_v14 = vadd.f32 %v1513_v46, %v1405_v10 }
 0x246   : > { %v2701_v48 = vpop.f32.mrf.mxu1 }
 0x247   : > { %v2715_v49 = vpop.f32.mrf.mxu0  ;;  %v1699_v21 = vadd.f32 %v1660_v47, %v1552_v14 }
 0x248   : > { %v1523_v50 = vpop.f32.mrf.mxu1 }
 0x249   : > { %v1670_v51 = vpop.f32.mrf.mxu0  ;;  %v1554_v31 = vadd.f32 %v1523_v50, %v1407_v17 }
 0x24a   : > { %v2704_v52 = vpop.f32.mrf.mxu1 }
 0x24b   : > { %v2718_v53 = vpop.f32.mrf.mxu0 }
 0x24c   : > { %v1533_v54 = vpop.f32.mrf.mxu1 }
 0x24d   : > { %v3636_v55 = vpop.f32.mrf.mxu0  ;;  %v1556_v46 = vadd.f32 %v1533_v54, %v1409_v22 }
 0x24e   : > { %3783 = vst [vmem:[#allocation27_spill] sm:$0xff] %v3636_v55  ;;  %v2707_v56 = vpop.f32.mrf.mxu1  ;;  %v1408_v55 = vadd.f32 %v2687_v33, %v1261_v6 }
 0x24f   : > { %v3638_v57 = vpop.f32.mrf.mxu0  ;;  %v1559_v27 = vadd.f32 %v2707_v56, %v1412_v38 }
 0x250   : > { %3784 = vst [vmem:[#allocation28_spill] sm:$0xff] %v3638_v57  ;;  %v1543_v59 = vpop.f32.mrf.mxu1  ;;  %v1553_v57 = vadd.f32 %v2698_v44, %v1406_v5  ;;  %v1555_v18 = vadd.f32 %v2701_v48, %v1408_v55 }
 0x251   : > { %v3640_v60 = vpop.f32.mrf.mxu0  ;;  %v1558_v54 = vadd.f32 %v1543_v59, %v1411_v26 }
 0x252   : > { %3785 = vst [vmem:[#allocation29_spill] sm:$0xff] %v3640_v60  ;;  %v2726_v63 = vpop.f32.mrf.mxu1  ;;  %v1263_v60 = vadd.f32 %v2676_v36, %v1106_v9  ;;  %v1700_v30 = vadd.f32 %v2712_v45, %v1553_v57  ;;  %v1702_v44 = vadd.f32 %v2715_v49, %v1555_v18  ;;  %v1701_v45 = vadd.f32 %v1670_v51, %v1554_v31 }
 0x253   : > { %v2740_v0 = vpop.f32.mrf.mxu0 }
 0x254   : > { %v1808_v3 = vpop.f32.mrf.mxu1  ;;  %v1410_v20 = vadd.f32 %v2690_v37, %v1263_v60  ;;  %v1848_v34 = vadd.f32 %v2726_v63, %v1700_v30 }
 0x255   : > { %v1955_v7 = vpop.f32.mrf.mxu0  ;;  %v1847_v25 = vadd.f32 %v1808_v3, %v1699_v21  ;;  %v3787_v41 = vld [vmem:[#allocation27_spill] sm:$0xff] }
 0x256   : > { %v2729_v8 = vpop.f32.mrf.mxu1  ;;  %v1557_v24 = vadd.f32 %v2704_v52, %v1410_v20  ;;  %v1995_v48 = vadd.f32 %v2740_v0, %v1848_v34  ;;  %v1703_v52 = vadd.f32 %v3787_v41, %v1556_v46 }
 0x257   : > { %v2743_v58 = vpop.f32.mrf.mxu0  ;;  %v1850_v55 = vadd.f32 %v2729_v8, %v1702_v44  ;;  %v1994_v47 = vadd.f32 %v1955_v7, %v1847_v25  ;;  %v3788_v56 = vld [vmem:[#allocation28_spill] sm:$0xff] }
 0x258   : > { %v1818_v13 = vpop.f32.mrf.mxu1  ;;  %v1704_v42 = vadd.f32 %v2718_v53, %v1557_v24  ;;  %v1706_v62 = vadd.f32 %v3788_v56, %v1559_v27 }
 0x259   : > { %v1965_v33 = vpop.f32.mrf.mxu0  ;;  %v1849_v49 = vadd.f32 %v1818_v13, %v1701_v45  ;;  %v1997_v57 = vadd.f32 %v2743_v58, %v1850_v55  ;;  %v3789_v3 = vld [vmem:[#allocation29_spill] sm:$0xff] }
 0x25a   : > { %v2732_v16 = vpop.f32.mrf.mxu1  ;;  %v1705_v4 = vadd.f32 %v3789_v3, %v1558_v54 }
 0x25b   : > { %v2746_v37 = vpop.f32.mrf.mxu0  ;;  %v1852_v60 = vadd.f32 %v2732_v16, %v1704_v42  ;;  %v1996_v1 = vadd.f32 %v1965_v33, %v1849_v49 }
 0x25c   : > { %v1828_v32 = vpop.f32.mrf.mxu1 }
 0x25d   : > { %v1975_v63 = vpop.f32.mrf.mxu0  ;;  %v1851_v2 = vadd.f32 %v1828_v32, %v1703_v52  ;;  %v1999_v6 = vadd.f32 %v2746_v37, %v1852_v60 }
 0x25e   : > { %v2735_v36 = vpop.f32.mrf.mxu1 }
 0x25f   : > { %v1854_v7 = vadd.f32 %v2735_v36, %v1706_v62  ;;  %v2749_v10 = vpop.f32.mrf.mxu0  ;;  %v1998_v12 = vadd.f32 %v1975_v63, %v1851_v2 }
 0x260   : > { %v1838_v35 = vpop.f32.mrf.mxu1 }
 0x261   : > { %v1853_v13 = vadd.f32 %v1838_v35, %v1705_v4  ;;  %v2001_v58 = vadd.f32 %v2749_v10, %v1854_v7  ;;  %v1985_v30 = vpop.f32.mrf.mxu0 }
 0x262   : > { %v2754_v40 = vpop.f32.mrf.mxu1 }
 0x263   : > { %v2142_v50 = vadd.f32 %v2754_v40, %v1995_v48  ;;  %v2000_v19 = vadd.f32 %v1985_v30, %v1853_v13 }
 0x264   : > { %v2102_v51 = vpop.f32.mrf.mxu1 }
 0x265   : > { %v2156_v61 = vadd.f32 %v2504_v39, %v2142_v50  ;;  %v2141_v43 = vadd.f32 %v2102_v51, %v1994_v47 }
 0x266   : > { %v2757_v0 = vpop.f32.mrf.mxu1 }
 0x267   : > { %2164 = vst.msk [vmem:[%s3650_s18 + $0x8] sm:$0xff] %vm518_vm1, %v2156_v61  ;;  %v2155_v53 = vadd.f32 %v2504_v39, %v2141_v43  ;;  %v2144_v59 = vadd.f32 %v2757_v0, %v1997_v57 }
 0x268   : > { %v2112_v5 = vpop.f32.mrf.mxu1 }
 0x269   : > { %2163 = vst.msk [vmem:[%s3650_s18] sm:$0xff] %vm518_vm1, %v2155_v53  ;;  %v2158_v8 = vadd.f32 %v2504_v39, %v2144_v59  ;;  %v2143_v9 = vadd.f32 %v2112_v5, %v1996_v1 }
 0x26a   : > { %v2760_v11 = vpop.f32.mrf.mxu1 }
 0x26b   : > { %2166 = vst.msk [vmem:[%s3650_s18 + $0x18] sm:$0xff] %vm518_vm1, %v2158_v8  ;;  %v2157_v14 = vadd.f32 %v2504_v39, %v2143_v9  ;;  %v2146_v15 = vadd.f32 %v2760_v11, %v1999_v6 }
 0x26c   : > { %v2122_v28 = vpop.f32.mrf.mxu1 }
 0x26d   : > { %2165 = vst.msk [vmem:[%s3650_s18 + $0x10] sm:$0xff] %vm518_vm1, %v2157_v14  ;;  %v2160_v16 = vadd.f32 %v2504_v39, %v2146_v15  ;;  %v2145_v17 = vadd.f32 %v2122_v28, %v1998_v12 }
 0x26e   : > { %v2763_v18 = vpop.f32.mrf.mxu1 }
 0x26f   : > { %2168 = vst.msk [vmem:[%s3650_s18 + $0x28] sm:$0xff] %vm518_vm1, %v2160_v16  ;;  %v2159_v29 = vadd.f32 %v2504_v39, %v2145_v17  ;;  %v2148_v32 = vadd.f32 %v2763_v18, %v2001_v58 }
 0x270   : > { %v2132_v20 = vpop.f32.mrf.mxu1 }
 0x271   : > { %2167 = vst.msk [vmem:[%s3650_s18 + $0x20] sm:$0xff] %vm518_vm1, %v2159_v29  ;;  %v2162_v21 = vadd.f32 %v2504_v39, %v2148_v32  ;;  %v2147_v31 = vadd.f32 %v2132_v20, %v2000_v19 }
 0x273   : > { %2170 = vst.msk [vmem:[%s3650_s18 + $0x38] sm:$0xff] %vm518_vm1, %v2162_v21  ;;  %v2161_v34 = vadd.f32 %v2504_v39, %v2147_v31 }
 0x275   : > { %2169 = vst.msk [vmem:[%s3650_s18 + $0x30] sm:$0xff] %vm518_vm1, %v2161_v34 }
 0x276   : > { %3043 = shalt.err (!%p3040_p4)
}
 0x277   : > { %s3044_s29 = scalar_lea.hbm %s3673_s10, 1024  ;;  %s3048_s9 = scalar_lea.hbm %s3790_s1, 2048 }
 0x278   : > { %p3045_p6 = scmp.ne.s32.totalorder %s3673_s10, %s3044_s29  ;;  %p3049_p12 = scmp.lt.s32.totalorder %s3673_s10, %s3790_s1 }
 0x279   : > { %p3050_p13 = scmp.lt.s32.totalorder %s3048_s9, %s3044_s29 }
 0x27a   : > { %p3046_p8 = pnand %p3045_p6, %p3782_p2 }
 0x27b   : > { %p3051_p10 = por %p3050_p13, %p3049_p12 }
 0x27c   : > { %p3047_p11 = pneg %p3046_p8 }
 0x27e   : > { %p3052_p3 = pnand %p3051_p10, %p3047_p11 }
 0x280   : > { %3055 = shalt.err (!%p3052_p3)
}
 0x281   : > { %2778 = dma.vmem_to_hbm [thread:$0]  (%p3782_p2), %s3675_s16, 1024, %s3673_s10, %s2172_s26, %s3134_s17, %s3134_s17, %s3135_s22  }
 0x282 PF: > { %s3791_s7 = sld [smem:[#allocation20_spill]] }
 0x283   : > { %s3792_s15 = sld [smem:[#allocation24_spill]] }
 0x284   : > { %s3793_s11 = sld [smem:[#allocation23_spill]] }
 0x288   : > { %s2225_s13 = sand.u32 1, %s3791_s7  }
 0x289   : > { %p3794_p7 = scmp.ne.s32.totalorder %s3792_s15, 0  ;;  %s2226_s14 = scalar_lea.sflag [#allocation5], %s2225_s13 }
 0x28a   : > { %p3795_p9 = scmp.ge.s32.totalorder %s3793_s11, 2 }
 0x28c   : > { %p2800_p0 = pnand %p3795_p9, %p3794_p7 }
 0x28e   : > { %p2801_p5 = pneg %p2800_p0 }
 0x290   : > { %3093 = dma.done.wait (%p2801_p5), %s2226_s14, 1024  }
 0x291   : > { %3095 = vsyncadd (%p2801_p5), %s2226_s14, 4294966272  ;;  %s2235_s18 = scalar_lea.sflag [#allocation14], %s2225_s13 }
 0x292   : > { %3097 = dma.done.wait (%p2801_p5), %s2235_s18, 1024  }
 0x293   : > { %3099 = vsyncadd (%p2801_p5), %s2235_s18, 4294966272  ;;  %s32_s10 = sadd.s32 1, %s3793_s11   ;;  %s3796_s25 = sld [smem:[#allocation21_spill]] }
 0x294   : > { %p29_p1 = scmp.ge.s32.totalorder %s32_s10, 4   ;;  %s3797_s29 = sld [smem:[#allocation26_spill]] }
 0x295   : > { %s3798_s30 = sld [smem:[#allocation22_spill]]  ;;  %s3800_s27 = smov %s3106_s28 }
 0x296   : > { %s3799_s9 = sld [smem:[#allocation25_spill]]  ;;  %31 = sbr.rel (!%p29_p1) target bundleno = 17 (0x11), region = 153 }
 0x299   : > { %s3801_s28 = smov %s3796_s25 }
 0x29b   :  { %2240 = vsyncpa [#allocation4], 1 }
 0x29c   :  { %2242 = vsyncpa [#allocation4 + $0x1], 1 }
 0x29d   :  { %2243 = vsyncpa [#allocation7], 1 }
 0x29e   :  { %2245 = vsyncpa [#allocation7 + $0x1], 1 }
 0x29f   :  { %2246 = vsyncpa [#allocation10], 1 }
 0x2a0   :  { %2247 = vsyncpa [#allocation5], 1 }
 0x2a1   :  { %2249 = vsyncpa [#allocation5 + $0x1], 1 }
 0x2a2   :  { %2250 = vsyncpa [#allocation14], 1 }
 0x2a3   :  { %2252 = vsyncpa [#allocation14 + $0x1], 1 }

</bundles_post_ra>
